<compile_context>
chip_gen: v6e
topology: v6e:2x2x1
jax: 0.10.0
libtpu: 0.0.40
codegen_flags: <defaults>
</compile_context>

<pallas_src>
import jax
import jax.numpy as jnp
from jax import lax
from jax.experimental import pallas as pl
from jax.experimental.pallas import tpu as pltpu

# ---- module config (matches the torch spec; batch=2 per instructions) -------------
BATCH = 2
NX = 768
HEAD_SIZE = 64
N_CTX = 30
N_HEADS = NX // HEAD_SIZE            # 12


# ----------------------------- Pallas kernel ---------------------------------------
def _attention_kernel(q_ref, k_ref, v_ref, pk_ref, pv_ref, o_ref):
    """One program handles every (batch, head) pair of the cached-token attention.

    q/k/v : (B, H*D) activations for the single new token.
    pk/pv : (B, H//2, T_pad, 2*D) cached keys / values — seq-major, heads paired on
            the lane axis (128 lanes per pair), T zero-padded to a multiple of 8.
    o     : (B, H*D) lane-dense output.
    No softmax / no 1/sqrt(D) scaling — mirrors the reference exactly.
    """
    B, P, T, DD = pk_ref.shape                      # DD = 2 * head_size = 128
    D = DD // 2
    f32 = jnp.float32

    q = q_ref[...].astype(f32)                      # (B, H*D)
    k = k_ref[...].astype(f32)
    v = v_ref[...].astype(f32)
    qk = q * k                                      # hoisted full-lane multiply (item #4)

    # Lane-segment selectors, built once (same shape for every pair).
    seg3 = lax.broadcasted_iota(jnp.int32, (B, T, DD), 2) < D    # (B, T, 2D)
    seg2 = lax.broadcasted_iota(jnp.int32, (B, DD), 1) < D       # (B, 2D)

    for p in range(P):                              # unrolled at trace time (static P)
        lo, hi = p * DD, (p + 1) * DD
        q_pair = q[:, lo:hi]                        # (B, 2D)
        v_pair = v[:, lo:hi]                        # (B, 2D)
        pk_p = pk_ref[:, p].astype(f32)             # (B, T, 2D)
        pv_p = pv_ref[:, p].astype(f32)             # (B, T, 2D)

        # scores against the cached context: full-128-lane multiply, then one
        # segment reduction per head of the pair (contraction over D).
        prod = q_pair[:, None, :] * pk_p                            # (B, T, 2D)
        s0 = jnp.sum(prod[:, :, :D], axis=-1, keepdims=True)        # (B, T, 1)
        s1 = jnp.sum(prod[:, :, D:], axis=-1, keepdims=True)        # (B, T, 1)
        w = jnp.where(seg3, s0, s1)                                 # (B, T, 2D)

        # weighted sum over cached values: full-128-lane multiply, sublane reduce.
        ctx = jnp.sum(w * pv_p, axis=1)                             # (B, 2D)

        # score/value of the newly appended token (column T of the torch cat).
        qk_pair = qk[:, lo:hi]                                      # (B, 2D)
        sn0 = jnp.sum(qk_pair[:, :D], axis=-1, keepdims=True)       # (B, 1)
        sn1 = jnp.sum(qk_pair[:, D:], axis=-1, keepdims=True)       # (B, 1)
        s_new = jnp.where(seg2, sn0, sn1)                           # (B, 2D)

        # direct, aligned, unmasked 128-lane store (item #3).
        o_ref[:, lo:hi] = (ctx + s_new * v_pair).astype(o_ref.dtype)


# ----------------------------- cache preparation ------------------------------------
def prepare_cache(past_k_torch, past_v_torch, pad_multiple=8):
    """One-time conversion of the torch-layout caches to the kernel's persistent
    format: (B, H//2, T_pad, 2*D), seq-major, adjacent heads paired on the lane axis,
    T zero-padded up to a multiple of `pad_multiple`. Done once, off the decode path."""
    B, H, D, T = past_k_torch.shape
    assert H % 2 == 0, "head pairing needs an even head count"
    T_pad = ((T + pad_multiple - 1) // pad_multiple) * pad_multiple
    pk_seq = jnp.swapaxes(past_k_torch, -1, -2)      # (B, H, T, D) seq-major keys
    pv_seq = past_v_torch                            # (B, H, T, D)

    def to_pairs(x):
        x = x.reshape(B, H // 2, 2, T, D)
        x = jnp.swapaxes(x, 2, 3)                    # (B, H//2, T, 2, D)
        x = x.reshape(B, H // 2, T, 2 * D)
        return jnp.pad(x, ((0, 0), (0, 0), (0, T_pad - T), (0, 0)))

    return to_pairs(pk_seq), to_pairs(pv_seq)


# ----------------------------- wrapper ----------------------------------------------
def attention(q, k, v, pk_pairs, pv_pairs):
    """Attention.forward. pk_pairs / pv_pairs are the persistent-format caches
    produced by prepare_cache (seq-major, head-paired, T padded)."""
    B, nx = q.shape
    _, P, T_pad, DD = pk_pairs.shape
    assert nx == P * DD
    flops = 4 * B * P * DD * (T_pad + 1)
    bytes_accessed = (
        q.size * q.dtype.itemsize + k.size * k.dtype.itemsize + v.size * v.dtype.itemsize
        + pk_pairs.size * pk_pairs.dtype.itemsize + pv_pairs.size * pv_pairs.dtype.itemsize
        + B * nx * q.dtype.itemsize)
    return pl.pallas_call(
        _attention_kernel,
        out_shape=jax.ShapeDtypeStruct((B, nx), q.dtype),
        in_specs=[pl.BlockSpec(memory_space=pltpu.MemorySpace.VMEM) for _ in range(5)],
        out_specs=pl.BlockSpec(memory_space=pltpu.MemorySpace.VMEM),
        cost_estimate=pl.CostEstimate(flops=flops, transcendentals=0,
                                      bytes_accessed=bytes_accessed),
    )(q, k, v, pk_pairs, pv_pairs)


# ----------------------------- pure-JAX reference -----------------------------------
def attention_ref(q, k, v, past_k_torch, past_v_torch):
    """Literal transcription of the torch Attention.forward (no softmax / scaling)."""
    B, nx = q.shape
    _, H, D, T = past_k_torch.shape
    q4 = q.reshape(B, H, 1, D)
    k4 = k.reshape(B, H, D, 1)
    k_cat = jnp.concatenate([past_k_torch, k4], axis=-1)     # (B, H, D, T+1)
    w = jnp.matmul(q4, k_cat)                                # (B, H, 1, T+1)
    v4 = v.reshape(B, H, 1, D)
    v_cat = jnp.concatenate([past_v_torch, v4], axis=-2)     # (B, H, T+1, D)
    return jnp.matmul(w, v_cat).reshape(B, nx)


# ----------------------------- main --------------------------------------------------
if __name__ == "__main__":
    key = jax.random.PRNGKey(0)
    kq, kk, kv, kpk, kpv = jax.random.split(key, 5)
    q = jax.random.normal(kq, (BATCH, NX), jnp.float32)
    k = jax.random.normal(kk, (BATCH, NX), jnp.float32)
    v = jax.random.normal(kv, (BATCH, NX), jnp.float32)
    # Caches generated in the torch module's native layouts.
    past_k_torch = jax.random.normal(kpk, (BATCH, N_HEADS, HEAD_SIZE, N_CTX), jnp.float32)
    past_v_torch = jax.random.normal(kpv, (BATCH, N_HEADS, N_CTX, HEAD_SIZE), jnp.float32)

    # One-time conversion to the kernel's persistent cache format (off the hot path).
    pk_pairs, pv_pairs = prepare_cache(past_k_torch, past_v_torch)

    out = jax.jit(attention)(q, k, v, pk_pairs, pv_pairs)
    jax.block_until_ready(out)

    ref = attention_ref(q, k, v, past_k_torch, past_v_torch)
    assert out.shape == (BATCH, NX)
    assert jnp.allclose(out, ref, atol=1e-3, rtol=1e-4)
    print("KERNEL_OK")
</pallas_src>

<mosaic_0001>
module attributes {stable_mosaic.version = 11 : i64} {
  func.func @_attention_kernel(%arg0: memref<2x768xf32, #tpu.memory_space<vmem>>, %arg1: memref<2x768xf32, #tpu.memory_space<vmem>>, %arg2: memref<2x768xf32, #tpu.memory_space<vmem>>, %arg3: memref<2x6x32x128xf32, #tpu.memory_space<vmem>>, %arg4: memref<2x6x32x128xf32, #tpu.memory_space<vmem>>, %arg5: memref<2x768xf32, #tpu.memory_space<vmem>>) attributes {dimension_semantics = [], scalar_prefetch = 0 : i64, scratch_operands = 0 : i64, tpu.core_type = #tpu.core_type<tc>} {
    %c0 = arith.constant 0 : index
    %c0_0 = arith.constant 0 : index
    %0 = vector.load %arg0[%c0, %c0_0] : memref<2x768xf32, #tpu.memory_space<vmem>>, vector<2x768xf32>
    %c0_1 = arith.constant 0 : index
    %c0_2 = arith.constant 0 : index
    %1 = vector.load %arg1[%c0_1, %c0_2] : memref<2x768xf32, #tpu.memory_space<vmem>>, vector<2x768xf32>
    %c0_3 = arith.constant 0 : index
    %c0_4 = arith.constant 0 : index
    %2 = vector.load %arg2[%c0_3, %c0_4] : memref<2x768xf32, #tpu.memory_space<vmem>>, vector<2x768xf32>
    %3 = arith.mulf %0, %1 : vector<2x768xf32>
    %4 = tpu.iota {dimensions = array<i32: 2>} : vector<2x32x128xi32>
    %c64_i32 = arith.constant 64 : i32
    %5 = vector.broadcast %c64_i32 : i32 to vector<2x32x128xi32>
    %6 = arith.cmpi slt, %4, %5 : vector<2x32x128xi32>
    %7 = tpu.iota {dimensions = array<i32: 1>} : vector<2x128xi32>
    %c64_i32_5 = arith.constant 64 : i32
    %8 = vector.broadcast %c64_i32_5 : i32 to vector<2x128xi32>
    %9 = arith.cmpi slt, %7, %8 : vector<2x128xi32>
    %10 = vector.extract_strided_slice %0 {offsets = [0, 0], sizes = [2, 128], strides = [1, 1]} : vector<2x768xf32> to vector<2x128xf32>
    %11 = vector.extract_strided_slice %2 {offsets = [0, 0], sizes = [2, 128], strides = [1, 1]} : vector<2x768xf32> to vector<2x128xf32>
    %c0_6 = arith.constant 0 : index
    %c0_7 = arith.constant 0 : index
    %c0_8 = arith.constant 0 : index
    %c0_9 = arith.constant 0 : index
    %12 = vector.load %arg3[%c0_6, %c0_7, %c0_8, %c0_9] : memref<2x6x32x128xf32, #tpu.memory_space<vmem>>, vector<2x1x32x128xf32>
    %13 = vector.shape_cast %12 : vector<2x1x32x128xf32> to vector<2x32x128xf32>
    %c0_10 = arith.constant 0 : index
    %c0_11 = arith.constant 0 : index
    %c0_12 = arith.constant 0 : index
    %c0_13 = arith.constant 0 : index
    %14 = vector.load %arg4[%c0_10, %c0_11, %c0_12, %c0_13] : memref<2x6x32x128xf32, #tpu.memory_space<vmem>>, vector<2x1x32x128xf32>
    %15 = vector.shape_cast %14 : vector<2x1x32x128xf32> to vector<2x32x128xf32>
    %16 = vector.shape_cast %10 : vector<2x128xf32> to vector<2x1x128xf32>
    %17 = vector.broadcast %16 : vector<2x1x128xf32> to vector<2x32x128xf32>
    %18 = arith.mulf %17, %13 : vector<2x32x128xf32>
    %19 = vector.extract_strided_slice %18 {offsets = [0, 0, 0], sizes = [2, 32, 64], strides = [1, 1, 1]} : vector<2x32x128xf32> to vector<2x32x64xf32>
    %cst = arith.constant dense<0.000000e+00> : vector<2x32xf32>
    %20 = vector.multi_reduction <add>, %19, %cst [2] : vector<2x32x64xf32> to vector<2x32xf32>
    %21 = vector.shape_cast %20 : vector<2x32xf32> to vector<2x32x1xf32>
    %22 = vector.extract_strided_slice %18 {offsets = [0, 0, 64], sizes = [2, 32, 64], strides = [1, 1, 1]} : vector<2x32x128xf32> to vector<2x32x64xf32>
    %cst_14 = arith.constant dense<0.000000e+00> : vector<2x32xf32>
    %23 = vector.multi_reduction <add>, %22, %cst_14 [2] : vector<2x32x64xf32> to vector<2x32xf32>
    %24 = vector.shape_cast %23 : vector<2x32xf32> to vector<2x32x1xf32>
    %25 = vector.shape_cast %21 : vector<2x32x1xf32> to vector<2x32x1xf32>
    %26 = vector.broadcast %25 : vector<2x32x1xf32> to vector<2x32x128xf32>
    %27 = vector.shape_cast %24 : vector<2x32x1xf32> to vector<2x32x1xf32>
    %28 = vector.broadcast %27 : vector<2x32x1xf32> to vector<2x32x128xf32>
    %29 = arith.select %6, %26, %28 : vector<2x32x128xi1>, vector<2x32x128xf32>
    %30 = arith.mulf %29, %15 : vector<2x32x128xf32>
    %cst_15 = arith.constant dense<0.000000e+00> : vector<2x128xf32>
    %31 = vector.multi_reduction <add>, %30, %cst_15 [1] : vector<2x32x128xf32> to vector<2x128xf32>
    %32 = vector.extract_strided_slice %3 {offsets = [0, 0], sizes = [2, 128], strides = [1, 1]} : vector<2x768xf32> to vector<2x128xf32>
    %33 = vector.extract_strided_slice %32 {offsets = [0, 0], sizes = [2, 64], strides = [1, 1]} : vector<2x128xf32> to vector<2x64xf32>
    %cst_16 = arith.constant dense<0.000000e+00> : vector<2xf32>
    %34 = vector.multi_reduction <add>, %33, %cst_16 [1] : vector<2x64xf32> to vector<2xf32>
    %35 = vector.shape_cast %34 : vector<2xf32> to vector<2x1xf32>
    %36 = vector.extract_strided_slice %32 {offsets = [0, 64], sizes = [2, 64], strides = [1, 1]} : vector<2x128xf32> to vector<2x64xf32>
    %cst_17 = arith.constant dense<0.000000e+00> : vector<2xf32>
    %37 = vector.multi_reduction <add>, %36, %cst_17 [1] : vector<2x64xf32> to vector<2xf32>
    %38 = vector.shape_cast %37 : vector<2xf32> to vector<2x1xf32>
    %39 = vector.shape_cast %35 : vector<2x1xf32> to vector<2x1xf32>
    %40 = vector.broadcast %39 : vector<2x1xf32> to vector<2x128xf32>
    %41 = vector.shape_cast %38 : vector<2x1xf32> to vector<2x1xf32>
    %42 = vector.broadcast %41 : vector<2x1xf32> to vector<2x128xf32>
    %43 = arith.select %9, %40, %42 : vector<2x128xi1>, vector<2x128xf32>
    %44 = arith.mulf %43, %11 : vector<2x128xf32>
    %45 = arith.addf %31, %44 : vector<2x128xf32>
    %c0_18 = arith.constant 0 : index
    %c0_19 = arith.constant 0 : index
    %46 = vector.load %arg5[%c0_18, %c0_19] : memref<2x768xf32, #tpu.memory_space<vmem>>, vector<2x128xf32>
    tpu.vector_store %arg5[%c0_18, %c0_19], %45 {strides = array<i32>} : memref<2x768xf32, #tpu.memory_space<vmem>>, vector<2x128xf32>,
    %47 = vector.extract_strided_slice %0 {offsets = [0, 128], sizes = [2, 128], strides = [1, 1]} : vector<2x768xf32> to vector<2x128xf32>
    %48 = vector.extract_strided_slice %2 {offsets = [0, 128], sizes = [2, 128], strides = [1, 1]} : vector<2x768xf32> to vector<2x128xf32>
    %c0_20 = arith.constant 0 : index
    %c1 = arith.constant 1 : index
    %c0_21 = arith.constant 0 : index
    %c0_22 = arith.constant 0 : index
    %49 = vector.load %arg3[%c0_20, %c1, %c0_21, %c0_22] : memref<2x6x32x128xf32, #tpu.memory_space<vmem>>, vector<2x1x32x128xf32>
    %50 = vector.shape_cast %49 : vector<2x1x32x128xf32> to vector<2x32x128xf32>
    %c0_23 = arith.constant 0 : index
    %c1_24 = arith.constant 1 : index
    %c0_25 = arith.constant 0 : index
    %c0_26 = arith.constant 0 : index
    %51 = vector.load %arg4[%c0_23, %c1_24, %c0_25, %c0_26] : memref<2x6x32x128xf32, #tpu.memory_space<vmem>>, vector<2x1x32x128xf32>
    %52 = vector.shape_cast %51 : vector<2x1x32x128xf32> to vector<2x32x128xf32>
    %53 = vector.shape_cast %47 : vector<2x128xf32> to vector<2x1x128xf32>
    %54 = vector.broadcast %53 : vector<2x1x128xf32> to vector<2x32x128xf32>
    %55 = arith.mulf %54, %50 : vector<2x32x128xf32>
    %56 = vector.extract_strided_slice %55 {offsets = [0, 0, 0], sizes = [2, 32, 64], strides = [1, 1, 1]} : vector<2x32x128xf32> to vector<2x32x64xf32>
    %cst_27 = arith.constant dense<0.000000e+00> : vector<2x32xf32>
    %57 = vector.multi_reduction <add>, %56, %cst_27 [2] : vector<2x32x64xf32> to vector<2x32xf32>
    %58 = vector.shape_cast %57 : vector<2x32xf32> to vector<2x32x1xf32>
    %59 = vector.extract_strided_slice %55 {offsets = [0, 0, 64], sizes = [2, 32, 64], strides = [1, 1, 1]} : vector<2x32x128xf32> to vector<2x32x64xf32>
    %cst_28 = arith.constant dense<0.000000e+00> : vector<2x32xf32>
    %60 = vector.multi_reduction <add>, %59, %cst_28 [2] : vector<2x32x64xf32> to vector<2x32xf32>
    %61 = vector.shape_cast %60 : vector<2x32xf32> to vector<2x32x1xf32>
    %62 = vector.shape_cast %58 : vector<2x32x1xf32> to vector<2x32x1xf32>
    %63 = vector.broadcast %62 : vector<2x32x1xf32> to vector<2x32x128xf32>
    %64 = vector.shape_cast %61 : vector<2x32x1xf32> to vector<2x32x1xf32>
    %65 = vector.broadcast %64 : vector<2x32x1xf32> to vector<2x32x128xf32>
    %66 = arith.select %6, %63, %65 : vector<2x32x128xi1>, vector<2x32x128xf32>
    %67 = arith.mulf %66, %52 : vector<2x32x128xf32>
    %cst_29 = arith.constant dense<0.000000e+00> : vector<2x128xf32>
    %68 = vector.multi_reduction <add>, %67, %cst_29 [1] : vector<2x32x128xf32> to vector<2x128xf32>
    %69 = vector.extract_strided_slice %3 {offsets = [0, 128], sizes = [2, 128], strides = [1, 1]} : vector<2x768xf32> to vector<2x128xf32>
    %70 = vector.extract_strided_slice %69 {offsets = [0, 0], sizes = [2, 64], strides = [1, 1]} : vector<2x128xf32> to vector<2x64xf32>
    %cst_30 = arith.constant dense<0.000000e+00> : vector<2xf32>
    %71 = vector.multi_reduction <add>, %70, %cst_30 [1] : vector<2x64xf32> to vector<2xf32>
    %72 = vector.shape_cast %71 : vector<2xf32> to vector<2x1xf32>
    %73 = vector.extract_strided_slice %69 {offsets = [0, 64], sizes = [2, 64], strides = [1, 1]} : vector<2x128xf32> to vector<2x64xf32>
    %cst_31 = arith.constant dense<0.000000e+00> : vector<2xf32>
    %74 = vector.multi_reduction <add>, %73, %cst_31 [1] : vector<2x64xf32> to vector<2xf32>
    %75 = vector.shape_cast %74 : vector<2xf32> to vector<2x1xf32>
    %76 = vector.shape_cast %72 : vector<2x1xf32> to vector<2x1xf32>
    %77 = vector.broadcast %76 : vector<2x1xf32> to vector<2x128xf32>
    %78 = vector.shape_cast %75 : vector<2x1xf32> to vector<2x1xf32>
    %79 = vector.broadcast %78 : vector<2x1xf32> to vector<2x128xf32>
    %80 = arith.select %9, %77, %79 : vector<2x128xi1>, vector<2x128xf32>
    %81 = arith.mulf %80, %48 : vector<2x128xf32>
    %82 = arith.addf %68, %81 : vector<2x128xf32>
    %c0_32 = arith.constant 0 : index
    %c128 = arith.constant 128 : index
    %83 = vector.load %arg5[%c0_32, %c128] : memref<2x768xf32, #tpu.memory_space<vmem>>, vector<2x128xf32>
    tpu.vector_store %arg5[%c0_32, %c128], %82 {strides = array<i32>} : memref<2x768xf32, #tpu.memory_space<vmem>>, vector<2x128xf32>,
    %84 = vector.extract_strided_slice %0 {offsets = [0, 256], sizes = [2, 128], strides = [1, 1]} : vector<2x768xf32> to vector<2x128xf32>
    %85 = vector.extract_strided_slice %2 {offsets = [0, 256], sizes = [2, 128], strides = [1, 1]} : vector<2x768xf32> to vector<2x128xf32>
    %c0_33 = arith.constant 0 : index
    %c2 = arith.constant 2 : index
    %c0_34 = arith.constant 0 : index
    %c0_35 = arith.constant 0 : index
    %86 = vector.load %arg3[%c0_33, %c2, %c0_34, %c0_35] : memref<2x6x32x128xf32, #tpu.memory_space<vmem>>, vector<2x1x32x128xf32>
    %87 = vector.shape_cast %86 : vector<2x1x32x128xf32> to vector<2x32x128xf32>
    %c0_36 = arith.constant 0 : index
    %c2_37 = arith.constant 2 : index
    %c0_38 = arith.constant 0 : index
    %c0_39 = arith.constant 0 : index
    %88 = vector.load %arg4[%c0_36, %c2_37, %c0_38, %c0_39] : memref<2x6x32x128xf32, #tpu.memory_space<vmem>>, vector<2x1x32x128xf32>
    %89 = vector.shape_cast %88 : vector<2x1x32x128xf32> to vector<2x32x128xf32>
    %90 = vector.shape_cast %84 : vector<2x128xf32> to vector<2x1x128xf32>
    %91 = vector.broadcast %90 : vector<2x1x128xf32> to vector<2x32x128xf32>
    %92 = arith.mulf %91, %87 : vector<2x32x128xf32>
    %93 = vector.extract_strided_slice %92 {offsets = [0, 0, 0], sizes = [2, 32, 64], strides = [1, 1, 1]} : vector<2x32x128xf32> to vector<2x32x64xf32>
    %cst_40 = arith.constant dense<0.000000e+00> : vector<2x32xf32>
    %94 = vector.multi_reduction <add>, %93, %cst_40 [2] : vector<2x32x64xf32> to vector<2x32xf32>
    %95 = vector.shape_cast %94 : vector<2x32xf32> to vector<2x32x1xf32>
    %96 = vector.extract_strided_slice %92 {offsets = [0, 0, 64], sizes = [2, 32, 64], strides = [1, 1, 1]} : vector<2x32x128xf32> to vector<2x32x64xf32>
    %cst_41 = arith.constant dense<0.000000e+00> : vector<2x32xf32>
    %97 = vector.multi_reduction <add>, %96, %cst_41 [2] : vector<2x32x64xf32> to vector<2x32xf32>
    %98 = vector.shape_cast %97 : vector<2x32xf32> to vector<2x32x1xf32>
    %99 = vector.shape_cast %95 : vector<2x32x1xf32> to vector<2x32x1xf32>
    %100 = vector.broadcast %99 : vector<2x32x1xf32> to vector<2x32x128xf32>
    %101 = vector.shape_cast %98 : vector<2x32x1xf32> to vector<2x32x1xf32>
    %102 = vector.broadcast %101 : vector<2x32x1xf32> to vector<2x32x128xf32>
    %103 = arith.select %6, %100, %102 : vector<2x32x128xi1>, vector<2x32x128xf32>
    %104 = arith.mulf %103, %89 : vector<2x32x128xf32>
    %cst_42 = arith.constant dense<0.000000e+00> : vector<2x128xf32>
    %105 = vector.multi_reduction <add>, %104, %cst_42 [1] : vector<2x32x128xf32> to vector<2x128xf32>
    %106 = vector.extract_strided_slice %3 {offsets = [0, 256], sizes = [2, 128], strides = [1, 1]} : vector<2x768xf32> to vector<2x128xf32>
    %107 = vector.extract_strided_slice %106 {offsets = [0, 0], sizes = [2, 64], strides = [1, 1]} : vector<2x128xf32> to vector<2x64xf32>
    %cst_43 = arith.constant dense<0.000000e+00> : vector<2xf32>
    %108 = vector.multi_reduction <add>, %107, %cst_43 [1] : vector<2x64xf32> to vector<2xf32>
    %109 = vector.shape_cast %108 : vector<2xf32> to vector<2x1xf32>
    %110 = vector.extract_strided_slice %106 {offsets = [0, 64], sizes = [2, 64], strides = [1, 1]} : vector<2x128xf32> to vector<2x64xf32>
    %cst_44 = arith.constant dense<0.000000e+00> : vector<2xf32>
    %111 = vector.multi_reduction <add>, %110, %cst_44 [1] : vector<2x64xf32> to vector<2xf32>
    %112 = vector.shape_cast %111 : vector<2xf32> to vector<2x1xf32>
    %113 = vector.shape_cast %109 : vector<2x1xf32> to vector<2x1xf32>
    %114 = vector.broadcast %113 : vector<2x1xf32> to vector<2x128xf32>
    %115 = vector.shape_cast %112 : vector<2x1xf32> to vector<2x1xf32>
    %116 = vector.broadcast %115 : vector<2x1xf32> to vector<2x128xf32>
    %117 = arith.select %9, %114, %116 : vector<2x128xi1>, vector<2x128xf32>
    %118 = arith.mulf %117, %85 : vector<2x128xf32>
    %119 = arith.addf %105, %118 : vector<2x128xf32>
    %c0_45 = arith.constant 0 : index
    %c256 = arith.constant 256 : index
    %120 = vector.load %arg5[%c0_45, %c256] : memref<2x768xf32, #tpu.memory_space<vmem>>, vector<2x128xf32>
    tpu.vector_store %arg5[%c0_45, %c256], %119 {strides = array<i32>} : memref<2x768xf32, #tpu.memory_space<vmem>>, vector<2x128xf32>,
    %121 = vector.extract_strided_slice %0 {offsets = [0, 384], sizes = [2, 128], strides = [1, 1]} : vector<2x768xf32> to vector<2x128xf32>
    %122 = vector.extract_strided_slice %2 {offsets = [0, 384], sizes = [2, 128], strides = [1, 1]} : vector<2x768xf32> to vector<2x128xf32>
    %c0_46 = arith.constant 0 : index
    %c3 = arith.constant 3 : index
    %c0_47 = arith.constant 0 : index
    %c0_48 = arith.constant 0 : index
    %123 = vector.load %arg3[%c0_46, %c3, %c0_47, %c0_48] : memref<2x6x32x128xf32, #tpu.memory_space<vmem>>, vector<2x1x32x128xf32>
    %124 = vector.shape_cast %123 : vector<2x1x32x128xf32> to vector<2x32x128xf32>
    %c0_49 = arith.constant 0 : index
    %c3_50 = arith.constant 3 : index
    %c0_51 = arith.constant 0 : index
    %c0_52 = arith.constant 0 : index
    %125 = vector.load %arg4[%c0_49, %c3_50, %c0_51, %c0_52] : memref<2x6x32x128xf32, #tpu.memory_space<vmem>>, vector<2x1x32x128xf32>
    %126 = vector.shape_cast %125 : vector<2x1x32x128xf32> to vector<2x32x128xf32>
    %127 = vector.shape_cast %121 : vector<2x128xf32> to vector<2x1x128xf32>
    %128 = vector.broadcast %127 : vector<2x1x128xf32> to vector<2x32x128xf32>
    %129 = arith.mulf %128, %124 : vector<2x32x128xf32>
    %130 = vector.extract_strided_slice %129 {offsets = [0, 0, 0], sizes = [2, 32, 64], strides = [1, 1, 1]} : vector<2x32x128xf32> to vector<2x32x64xf32>
    %cst_53 = arith.constant dense<0.000000e+00> : vector<2x32xf32>
    %131 = vector.multi_reduction <add>, %130, %cst_53 [2] : vector<2x32x64xf32> to vector<2x32xf32>
    %132 = vector.shape_cast %131 : vector<2x32xf32> to vector<2x32x1xf32>
    %133 = vector.extract_strided_slice %129 {offsets = [0, 0, 64], sizes = [2, 32, 64], strides = [1, 1, 1]} : vector<2x32x128xf32> to vector<2x32x64xf32>
    %cst_54 = arith.constant dense<0.000000e+00> : vector<2x32xf32>
    %134 = vector.multi_reduction <add>, %133, %cst_54 [2] : vector<2x32x64xf32> to vector<2x32xf32>
    %135 = vector.shape_cast %134 : vector<2x32xf32> to vector<2x32x1xf32>
    %136 = vector.shape_cast %132 : vector<2x32x1xf32> to vector<2x32x1xf32>
    %137 = vector.broadcast %136 : vector<2x32x1xf32> to vector<2x32x128xf32>
    %138 = vector.shape_cast %135 : vector<2x32x1xf32> to vector<2x32x1xf32>
    %139 = vector.broadcast %138 : vector<2x32x1xf32> to vector<2x32x128xf32>
    %140 = arith.select %6, %137, %139 : vector<2x32x128xi1>, vector<2x32x128xf32>
    %141 = arith.mulf %140, %126 : vector<2x32x128xf32>
    %cst_55 = arith.constant dense<0.000000e+00> : vector<2x128xf32>
    %142 = vector.multi_reduction <add>, %141, %cst_55 [1] : vector<2x32x128xf32> to vector<2x128xf32>
    %143 = vector.extract_strided_slice %3 {offsets = [0, 384], sizes = [2, 128], strides = [1, 1]} : vector<2x768xf32> to vector<2x128xf32>
    %144 = vector.extract_strided_slice %143 {offsets = [0, 0], sizes = [2, 64], strides = [1, 1]} : vector<2x128xf32> to vector<2x64xf32>
    %cst_56 = arith.constant dense<0.000000e+00> : vector<2xf32>
    %145 = vector.multi_reduction <add>, %144, %cst_56 [1] : vector<2x64xf32> to vector<2xf32>
    %146 = vector.shape_cast %145 : vector<2xf32> to vector<2x1xf32>
    %147 = vector.extract_strided_slice %143 {offsets = [0, 64], sizes = [2, 64], strides = [1, 1]} : vector<2x128xf32> to vector<2x64xf32>
    %cst_57 = arith.constant dense<0.000000e+00> : vector<2xf32>
    %148 = vector.multi_reduction <add>, %147, %cst_57 [1] : vector<2x64xf32> to vector<2xf32>
    %149 = vector.shape_cast %148 : vector<2xf32> to vector<2x1xf32>
    %150 = vector.shape_cast %146 : vector<2x1xf32> to vector<2x1xf32>
    %151 = vector.broadcast %150 : vector<2x1xf32> to vector<2x128xf32>
    %152 = vector.shape_cast %149 : vector<2x1xf32> to vector<2x1xf32>
    %153 = vector.broadcast %152 : vector<2x1xf32> to vector<2x128xf32>
    %154 = arith.select %9, %151, %153 : vector<2x128xi1>, vector<2x128xf32>
    %155 = arith.mulf %154, %122 : vector<2x128xf32>
    %156 = arith.addf %142, %155 : vector<2x128xf32>
    %c0_58 = arith.constant 0 : index
    %c384 = arith.constant 384 : index
    %157 = vector.load %arg5[%c0_58, %c384] : memref<2x768xf32, #tpu.memory_space<vmem>>, vector<2x128xf32>
    tpu.vector_store %arg5[%c0_58, %c384], %156 {strides = array<i32>} : memref<2x768xf32, #tpu.memory_space<vmem>>, vector<2x128xf32>,
    %158 = vector.extract_strided_slice %0 {offsets = [0, 512], sizes = [2, 128], strides = [1, 1]} : vector<2x768xf32> to vector<2x128xf32>
    %159 = vector.extract_strided_slice %2 {offsets = [0, 512], sizes = [2, 128], strides = [1, 1]} : vector<2x768xf32> to vector<2x128xf32>
    %c0_59 = arith.constant 0 : index
    %c4 = arith.constant 4 : index
    %c0_60 = arith.constant 0 : index
    %c0_61 = arith.constant 0 : index
    %160 = vector.load %arg3[%c0_59, %c4, %c0_60, %c0_61] : memref<2x6x32x128xf32, #tpu.memory_space<vmem>>, vector<2x1x32x128xf32>
    %161 = vector.shape_cast %160 : vector<2x1x32x128xf32> to vector<2x32x128xf32>
    %c0_62 = arith.constant 0 : index
    %c4_63 = arith.constant 4 : index
    %c0_64 = arith.constant 0 : index
    %c0_65 = arith.constant 0 : index
    %162 = vector.load %arg4[%c0_62, %c4_63, %c0_64, %c0_65] : memref<2x6x32x128xf32, #tpu.memory_space<vmem>>, vector<2x1x32x128xf32>
    %163 = vector.shape_cast %162 : vector<2x1x32x128xf32> to vector<2x32x128xf32>
    %164 = vector.shape_cast %158 : vector<2x128xf32> to vector<2x1x128xf32>
    %165 = vector.broadcast %164 : vector<2x1x128xf32> to vector<2x32x128xf32>
    %166 = arith.mulf %165, %161 : vector<2x32x128xf32>
    %167 = vector.extract_strided_slice %166 {offsets = [0, 0, 0], sizes = [2, 32, 64], strides = [1, 1, 1]} : vector<2x32x128xf32> to vector<2x32x64xf32>
    %cst_66 = arith.constant dense<0.000000e+00> : vector<2x32xf32>
    %168 = vector.multi_reduction <add>, %167, %cst_66 [2] : vector<2x32x64xf32> to vector<2x32xf32>
    %169 = vector.shape_cast %168 : vector<2x32xf32> to vector<2x32x1xf32>
    %170 = vector.extract_strided_slice %166 {offsets = [0, 0, 64], sizes = [2, 32, 64], strides = [1, 1, 1]} : vector<2x32x128xf32> to vector<2x32x64xf32>
    %cst_67 = arith.constant dense<0.000000e+00> : vector<2x32xf32>
    %171 = vector.multi_reduction <add>, %170, %cst_67 [2] : vector<2x32x64xf32> to vector<2x32xf32>
    %172 = vector.shape_cast %171 : vector<2x32xf32> to vector<2x32x1xf32>
    %173 = vector.shape_cast %169 : vector<2x32x1xf32> to vector<2x32x1xf32>
    %174 = vector.broadcast %173 : vector<2x32x1xf32> to vector<2x32x128xf32>
    %175 = vector.shape_cast %172 : vector<2x32x1xf32> to vector<2x32x1xf32>
    %176 = vector.broadcast %175 : vector<2x32x1xf32> to vector<2x32x128xf32>
    %177 = arith.select %6, %174, %176 : vector<2x32x128xi1>, vector<2x32x128xf32>
    %178 = arith.mulf %177, %163 : vector<2x32x128xf32>
    %cst_68 = arith.constant dense<0.000000e+00> : vector<2x128xf32>
    %179 = vector.multi_reduction <add>, %178, %cst_68 [1] : vector<2x32x128xf32> to vector<2x128xf32>
    %180 = vector.extract_strided_slice %3 {offsets = [0, 512], sizes = [2, 128], strides = [1, 1]} : vector<2x768xf32> to vector<2x128xf32>
    %181 = vector.extract_strided_slice %180 {offsets = [0, 0], sizes = [2, 64], strides = [1, 1]} : vector<2x128xf32> to vector<2x64xf32>
    %cst_69 = arith.constant dense<0.000000e+00> : vector<2xf32>
    %182 = vector.multi_reduction <add>, %181, %cst_69 [1] : vector<2x64xf32> to vector<2xf32>
    %183 = vector.shape_cast %182 : vector<2xf32> to vector<2x1xf32>
    %184 = vector.extract_strided_slice %180 {offsets = [0, 64], sizes = [2, 64], strides = [1, 1]} : vector<2x128xf32> to vector<2x64xf32>
    %cst_70 = arith.constant dense<0.000000e+00> : vector<2xf32>
    %185 = vector.multi_reduction <add>, %184, %cst_70 [1] : vector<2x64xf32> to vector<2xf32>
    %186 = vector.shape_cast %185 : vector<2xf32> to vector<2x1xf32>
    %187 = vector.shape_cast %183 : vector<2x1xf32> to vector<2x1xf32>
    %188 = vector.broadcast %187 : vector<2x1xf32> to vector<2x128xf32>
    %189 = vector.shape_cast %186 : vector<2x1xf32> to vector<2x1xf32>
    %190 = vector.broadcast %189 : vector<2x1xf32> to vector<2x128xf32>
    %191 = arith.select %9, %188, %190 : vector<2x128xi1>, vector<2x128xf32>
    %192 = arith.mulf %191, %159 : vector<2x128xf32>
    %193 = arith.addf %179, %192 : vector<2x128xf32>
    %c0_71 = arith.constant 0 : index
    %c512 = arith.constant 512 : index
    %194 = vector.load %arg5[%c0_71, %c512] : memref<2x768xf32, #tpu.memory_space<vmem>>, vector<2x128xf32>
    tpu.vector_store %arg5[%c0_71, %c512], %193 {strides = array<i32>} : memref<2x768xf32, #tpu.memory_space<vmem>>, vector<2x128xf32>,
    %195 = vector.extract_strided_slice %0 {offsets = [0, 640], sizes = [2, 128], strides = [1, 1]} : vector<2x768xf32> to vector<2x128xf32>
    %196 = vector.extract_strided_slice %2 {offsets = [0, 640], sizes = [2, 128], strides = [1, 1]} : vector<2x768xf32> to vector<2x128xf32>
    %c0_72 = arith.constant 0 : index
    %c5 = arith.constant 5 : index
    %c0_73 = arith.constant 0 : index
    %c0_74 = arith.constant 0 : index
    %197 = vector.load %arg3[%c0_72, %c5, %c0_73, %c0_74] : memref<2x6x32x128xf32, #tpu.memory_space<vmem>>, vector<2x1x32x128xf32>
    %198 = vector.shape_cast %197 : vector<2x1x32x128xf32> to vector<2x32x128xf32>
    %c0_75 = arith.constant 0 : index
    %c5_76 = arith.constant 5 : index
    %c0_77 = arith.constant 0 : index
    %c0_78 = arith.constant 0 : index
    %199 = vector.load %arg4[%c0_75, %c5_76, %c0_77, %c0_78] : memref<2x6x32x128xf32, #tpu.memory_space<vmem>>, vector<2x1x32x128xf32>
    %200 = vector.shape_cast %199 : vector<2x1x32x128xf32> to vector<2x32x128xf32>
    %201 = vector.shape_cast %195 : vector<2x128xf32> to vector<2x1x128xf32>
    %202 = vector.broadcast %201 : vector<2x1x128xf32> to vector<2x32x128xf32>
    %203 = arith.mulf %202, %198 : vector<2x32x128xf32>
    %204 = vector.extract_strided_slice %203 {offsets = [0, 0, 0], sizes = [2, 32, 64], strides = [1, 1, 1]} : vector<2x32x128xf32> to vector<2x32x64xf32>
    %cst_79 = arith.constant dense<0.000000e+00> : vector<2x32xf32>
    %205 = vector.multi_reduction <add>, %204, %cst_79 [2] : vector<2x32x64xf32> to vector<2x32xf32>
    %206 = vector.shape_cast %205 : vector<2x32xf32> to vector<2x32x1xf32>
    %207 = vector.extract_strided_slice %203 {offsets = [0, 0, 64], sizes = [2, 32, 64], strides = [1, 1, 1]} : vector<2x32x128xf32> to vector<2x32x64xf32>
    %cst_80 = arith.constant dense<0.000000e+00> : vector<2x32xf32>
    %208 = vector.multi_reduction <add>, %207, %cst_80 [2] : vector<2x32x64xf32> to vector<2x32xf32>
    %209 = vector.shape_cast %208 : vector<2x32xf32> to vector<2x32x1xf32>
    %210 = vector.shape_cast %206 : vector<2x32x1xf32> to vector<2x32x1xf32>
    %211 = vector.broadcast %210 : vector<2x32x1xf32> to vector<2x32x128xf32>
    %212 = vector.shape_cast %209 : vector<2x32x1xf32> to vector<2x32x1xf32>
    %213 = vector.broadcast %212 : vector<2x32x1xf32> to vector<2x32x128xf32>
    %214 = arith.select %6, %211, %213 : vector<2x32x128xi1>, vector<2x32x128xf32>
    %215 = arith.mulf %214, %200 : vector<2x32x128xf32>
    %cst_81 = arith.constant dense<0.000000e+00> : vector<2x128xf32>
    %216 = vector.multi_reduction <add>, %215, %cst_81 [1] : vector<2x32x128xf32> to vector<2x128xf32>
    %217 = vector.extract_strided_slice %3 {offsets = [0, 640], sizes = [2, 128], strides = [1, 1]} : vector<2x768xf32> to vector<2x128xf32>
    %218 = vector.extract_strided_slice %217 {offsets = [0, 0], sizes = [2, 64], strides = [1, 1]} : vector<2x128xf32> to vector<2x64xf32>
    %cst_82 = arith.constant dense<0.000000e+00> : vector<2xf32>
    %219 = vector.multi_reduction <add>, %218, %cst_82 [1] : vector<2x64xf32> to vector<2xf32>
    %220 = vector.shape_cast %219 : vector<2xf32> to vector<2x1xf32>
    %221 = vector.extract_strided_slice %217 {offsets = [0, 64], sizes = [2, 64], strides = [1, 1]} : vector<2x128xf32> to vector<2x64xf32>
    %cst_83 = arith.constant dense<0.000000e+00> : vector<2xf32>
    %222 = vector.multi_reduction <add>, %221, %cst_83 [1] : vector<2x64xf32> to vector<2xf32>
    %223 = vector.shape_cast %222 : vector<2xf32> to vector<2x1xf32>
    %224 = vector.shape_cast %220 : vector<2x1xf32> to vector<2x1xf32>
    %225 = vector.broadcast %224 : vector<2x1xf32> to vector<2x128xf32>
    %226 = vector.shape_cast %223 : vector<2x1xf32> to vector<2x1xf32>
    %227 = vector.broadcast %226 : vector<2x1xf32> to vector<2x128xf32>
    %228 = arith.select %9, %225, %227 : vector<2x128xi1>, vector<2x128xf32>
    %229 = arith.mulf %228, %196 : vector<2x128xf32>
    %230 = arith.addf %216, %229 : vector<2x128xf32>
    %c0_84 = arith.constant 0 : index
    %c640 = arith.constant 640 : index
    %231 = vector.load %arg5[%c0_84, %c640] : memref<2x768xf32, #tpu.memory_space<vmem>>, vector<2x128xf32>
    tpu.vector_store %arg5[%c0_84, %c640], %230 {strides = array<i32>} : memref<2x768xf32, #tpu.memory_space<vmem>>, vector<2x128xf32>,
    return
  }
}

</mosaic_0001>

<bundles_post_ra>
// kernel: attention.1
= control target key start
LH: loop header
LB: loop body
LE: loop exit
PB: predicated region body
PF: predicated region fallthrough
CT: control target
= control target key end

     0   :  { %10 = vsyncpa [#allocation3], 0  ;;  %s2169_s0 = inlined_call_operand.hbm [shape: f32[2,768], index: 0, kind: input, shape index: {}]   ;;  %s2170_s1 = inlined_call_operand.hbm [shape: f32[2,768], index: 1, kind: input, shape index: {}]   ;;  %s2171_s2 = inlined_call_operand.hbm [shape: f32[2,768], index: 2, kind: input, shape index: {}]   ;;  %s2172_s3 = inlined_call_operand.hbm [shape: f32[2,6,32,128], index: 3, kind: input, shape index: {}]   ;;  %s2173_s4 = inlined_call_operand.hbm [shape: f32[2,6,32,128], index: 4, kind: input, shape index: {}]   ;;  %s2174_s5 = inlined_call_operand.hbm [shape: f32[2,768], index: 5, kind: output, shape index: {}]  }
   0x1   :  { %11 = vsyncpa [#allocation6], 0 }
   0x2   :  { %12 = vsyncpa [#allocation9], 0 }
   0x3   :  { %13 = vsyncpa [#allocation4], 0  ;;  %s1497_s18 = smov [#allocation5]   ;;  %s1498_s20 = smov [#allocation8]  }
   0x4   :  { %s30_s19 = sshll.u32 %s1497_s18, 4  ;;  %s49_s21 = sshll.u32 %s1498_s20, 4  ;;  %s31_s19 = int_to_ptr.vmem [resolvable:$true] %s30_s19  ;;  %s50_s21 = int_to_ptr.vmem [resolvable:$true] %s49_s21 }
   0x5   :  { %s1377_s22 = scalar_lea.vmem %s31_s19, 192  ;;  %p1382_p1 = scmp.lt.s32.totalorder %s31_s19, %s31_s19 }
   0x6   :  { %p1378_p0 = scmp.ne.s32.totalorder %s31_s19, %s1377_s22  ;;  %p1383_p2 = scmp.lt.s32.totalorder %s1377_s22, %s1377_s22 }
   0x8   :  { %p1384_p3 = por %p1383_p2, %p1382_p1 }
   0xa   :  { %p1385_p4 = pnand %p1384_p3, %p1378_p0 }
   0xc   :  { %1388 = shalt.err (!%p1385_p4)
}
   0xd   :  { %33 = dma.hbm_to_vmem [thread:$0]  %s2170_s1, 192, %s31_s19, [#allocation6]  }
   0xe   :  { %s1397_s25 = scalar_lea.vmem %s50_s21, 6144  ;;  %p1402_p6 = scmp.lt.s32.totalorder %s50_s21, %s50_s21 }
   0xf   :  { %p1398_p5 = scmp.ne.s32.totalorder %s50_s21, %s1397_s25  ;;  %p1403_p7 = scmp.lt.s32.totalorder %s1397_s25, %s1397_s25 }
  0x11   :  { %p1404_p8 = por %p1403_p7, %p1402_p6 }
  0x13   :  { %p1405_p9 = pnand %p1404_p8, %p1398_p5 }
  0x15   :  { %1408 = shalt.err (!%p1405_p9)
}
  0x16   :  { %s1499_s26 = smov 128   ;;  %s1500_s27 = smov 8  }
  0x17   :  { %55 = dma.hbm_to_vmem [thread:$0]  %s2172_s3, 6144, %s50_s21, [#allocation9], %s1499_s26, %s1499_s26, %s1500_s27  }
  0x18   :  { %s1501_s30 = smov [#allocation2]   ;;  %s1502_s7 = smov [#allocation7]  }
  0x19   :  { %s20_s6 = sshll.u32 %s1501_s30, 4  ;;  %s40_s1 = sshll.u32 %s1502_s7, 4  ;;  %s21_s6 = int_to_ptr.vmem [resolvable:$true] %s20_s6  ;;  %s41_s1 = int_to_ptr.vmem [resolvable:$true] %s40_s1 }
  0x1a   :  { %s1417_s8 = scalar_lea.vmem %s21_s6, 192  ;;  %p1422_p11 = scmp.lt.s32.totalorder %s21_s6, %s21_s6 }
  0x1b   :  { %p1418_p10 = scmp.ne.s32.totalorder %s21_s6, %s1417_s8  ;;  %p1423_p12 = scmp.lt.s32.totalorder %s1417_s8, %s1417_s8 }
  0x1d   :  { %p1424_p13 = por %p1423_p12, %p1422_p11 }
  0x1f   :  { %p1425_p0 = pnand %p1424_p13, %p1418_p10 }
  0x21   :  { %1428 = shalt.err (!%p1425_p0)
}
  0x22   :  { %23 = dma.hbm_to_vmem [thread:$0]  %s2169_s0, 192, %s21_s6, [#allocation3]  }
  0x23   :  { %s1437_s11 = scalar_lea.vmem %s41_s1, 192  ;;  %p1442_p2 = scmp.lt.s32.totalorder %s41_s1, %s41_s1 }
  0x24   :  { %p1438_p1 = scmp.ne.s32.totalorder %s41_s1, %s1437_s11  ;;  %p1443_p3 = scmp.lt.s32.totalorder %s1437_s11, %s1437_s11 }
  0x26   :  { %p1444_p4 = por %p1443_p3, %p1442_p2 }
  0x28   :  { %p1445_p5 = pnand %p1444_p4, %p1438_p1 }
  0x2a   :  { %1448 = shalt.err (!%p1445_p5)
}
  0x2b   :  { %43 = dma.hbm_to_vmem [thread:$0]  %s2171_s2, 192, %s41_s1, [#allocation6]  }
  0x2c   :  { %s1503_s13 = smov [#allocation10]  }
  0x2d   :  { %s61_s14 = sshll.u32 %s1503_s13, 4  ;;  %s62_s14 = int_to_ptr.vmem [resolvable:$true] %s61_s14 }
  0x2e   :  { %s1457_s15 = scalar_lea.vmem %s62_s14, 6144  ;;  %p1462_p7 = scmp.lt.s32.totalorder %s62_s14, %s62_s14 }
  0x2f   :  { %p1458_p6 = scmp.ne.s32.totalorder %s62_s14, %s1457_s15  ;;  %p1463_p8 = scmp.lt.s32.totalorder %s1457_s15, %s1457_s15 }
  0x31   :  { %p1464_p9 = por %p1463_p8, %p1462_p7 }
  0x33   :  { %p1465_p10 = pnand %p1464_p9, %p1458_p6 }
  0x35   :  { %1468 = shalt.err (!%p1465_p10)
}
  0x36   :  { %67 = dma.hbm_to_vmem [thread:$0]  %s2173_s4, 6144, %s62_s14, [#allocation9], %s1499_s26, %s1499_s26, %s1500_s27  }
  0x37   :  { %1489 = dma.done.wait [#allocation3], 192  }
  0x38   :  { %1490 = vsyncadd [#allocation3], 4294967104 }
  0x39   :  { %1491 = dma.done.wait [#allocation6], 384  }
  0x3a   :  { %1492 = vsyncadd [#allocation6], 4294966912 }
  0x3b   :  { %1493 = dma.done.wait [#allocation9], 12288  }
  0x3c   :  { %1494 = vsyncadd [#allocation9], 4294955008  ;;  %v91_v0 = vlaneseq  ;;  %v1504_v1 = vmov 1966171168   ;;  %v83_v7 = vld [vmem:[#allocation2] sm:$0xff]  ;;  %v96_v9 = vld [vmem:[#allocation8 + $0x10] sm:$0xff] }
  0x3d   :  { %v112_v2 = vunpack.c.l.s4 %v1504_v1  ;;  %v97_v10 = vld [vmem:[#allocation8 + $0x18] sm:$0xff]  ;;  %v94_v11 = vld [vmem:[#allocation8] sm:$0xff]  ;;  %v95_v14 = vld [vmem:[#allocation8 + $0x8] sm:$0xff]  ;;  %vm137_vm0 = vcmask 523264   ;;  %s1505_s2 = smov 64   ;;  %vm252_vm1 = vcmask 517120  }
  0x3e   :  { %v115_v3 = vshrl.u32 %v91_v0, 7  ;;  %v99_v19 = vld [vmem:[#allocation8 + $0xc8] sm:$0xff]  ;;  %v98_v22 = vld [vmem:[#allocation8 + $0xc0] sm:$0xff]  ;;  %v101_v26 = vld [vmem:[#allocation8 + $0xd8] sm:$0xff]  ;;  %v1506_v36 = vmov 1983009808  }
  0x3f   :  { %v113_v4 = vunpack.c.0.s8 %v112_v2  ;;  %v100_v29 = vld [vmem:[#allocation8 + $0xd0] sm:$0xff]  ;;  %v258_v37 = vunpack.c.l.s4 %v1506_v36  ;;  %v85_v39 = vld [vmem:[#allocation5] sm:$0xff]  ;;  %v310_v45 = vld [vmem:[#allocation8 + $0x20] sm:$0xff]  ;;  %vm299_vm3 = vcmask 1041409   ;;  %vm301_vm4 = vcmask 1043459   ;;  %s1507_s4 = smov [#allocation11]  }
  0x40   :  { %v1562_v6 = vsub.s32 0, %v115_v3  ;;  %v1591_v41 = vmul.f32 %v85_v39, %v83_v7  ;;  %v311_v48 = vld [vmem:[#allocation8 + $0x28] sm:$0xff]  ;;  %v312_v51 = vld [vmem:[#allocation8 + $0x30] sm:$0xff]  ;;  %vm303_vm5 = vcmask 1045509   ;;  %vm305_vm6 = vcmask 1047559   ;;  %s1346_s17 = sshll.u32 %s1507_s4, 4  ;;  %s1347_s17 = int_to_ptr.vmem [resolvable:$true] %s1346_s17 }
  0x41   :  { %v1560_v5 = vsub.s32 %v113_v4, %v115_v3  ;;  %v259_v38 = vunpack.c.0.s8 %v258_v37  ;;  %v313_v4 = vld [vmem:[#allocation8 + $0x38] sm:$0xff]  ;;  %s1469_s18 = scalar_lea.vmem %s1347_s17, 192  ;;  %p1474_p12 = scmp.lt.s32.totalorder %s1347_s17, %s1347_s17 }
  0x42   :  { %v253_v46 = vsel %vm252_vm1, %v1591_v41, 0.0  ;;  %p1470_p11 = scmp.ne.s32.totalorder %s1347_s17, %s1469_s18  ;;  %p1475_p13 = scmp.lt.s32.totalorder %s1469_s18, %s1469_s18 }
  0x43   :  { %v1565_v8 = vrot.slane %v83_v7, %v1560_v5  ;;  %v1588_v40 = vsub.s32 %v259_v38, %v115_v3 }
  0x44   :  { %p1476_p0 = por %p1475_p13, %p1474_p12 }
  0x45   :  { %v122_v12 = vrot.slane %v1565_v8, %v1562_v6  ;;  %v1571_v13 = vcombine.high %v1565_v8, %v1565_v8  ;;  %v1597_v42 = vrot.slane %v1591_v41, %v1588_v40  ;;  %v327_v43 = vrot.slane %v1565_v8, 1 }
  0x46   :  { %p1477_p1 = pnand %p1476_p0, %p1470_p11 }
  0x47   :  { %v131_v15 = vmul.f32 %v122_v12, %v96_v9  ;;  %v132_v16 = vmul.f32 %v122_v12, %v97_v10  ;;  %v126_v17 = vrot.slane %v1571_v13, %v1562_v6  ;;  %v129_v18 = vmul.f32 %v122_v12, %v94_v11 }
  0x48   :  { %v130_v20 = vmul.f32 %v122_v12, %v95_v14  ;;  %v332_v44 = vrot.slane %v327_v43, %v1562_v6 }
  0x49   :  { %v144_v21 = vsel %vm137_vm0, %v131_v15, 0.0  ;;  %v138_v23 = vsel %vm137_vm0, %v129_v18, 0.0  ;;  %v147_v24 = vsel %vm137_vm0, %v132_v16, 0.0  ;;  %v134_v25 = vmul.f32 %v126_v17, %v99_v19 }
  0x4a   :  { %145 = vadd.xlane.f32.xlu1 %v144_v21  ;;  %139 = vadd.xlane.f32.xlu0 %v138_v23  ;;  %v141_v27 = vsel %vm137_vm0, %v130_v20, 0.0  ;;  %v133_v28 = vmul.f32 %v126_v17, %v98_v22  ;;  %v136_v31 = vmul.f32 %v126_v17, %v101_v26  ;;  %v135_v33 = vmul.f32 %v126_v17, %v100_v29  ;;  %v314_v26 = vld [vmem:[#allocation8 + $0xe0] sm:$0xff] }
  0x4b   :  { %v153_v30 = vsel %vm137_vm0, %v134_v25, 0.0  ;;  %v1605_v47 = vmul.f32 %v332_v44, %v310_v45  ;;  %v340_v50 = vmul.f32 %v332_v44, %v311_v48  ;;  %v1610_v53 = vmul.f32 %v332_v44, %v312_v51 }
  0x4c   :  { %v150_v32 = vsel %vm137_vm0, %v133_v28, 0.0  ;;  %v159_v34 = vsel %vm137_vm0, %v136_v31, 0.0  ;;  %v156_v35 = vsel %vm137_vm0, %v135_v33, 0.0  ;;  %v342_v10 = vmul.f32 %v332_v44, %v313_v4 }
  0x4d   :  { %v347_v49 = vsel %vm137_vm0, %v1605_v47, 0.0  ;;  %v350_v52 = vsel %vm137_vm0, %v340_v50, 0.0  ;;  %v353_v54 = vsel %vm137_vm0, %v1610_v53, 0.0  ;;  %v328_v21 = vrot.slane %v1571_v13, 1 }
  0x4e   :  { %148 = vadd.xlane.f32.xlu1 %v147_v24  ;;  %142 = vadd.xlane.f32.xlu0 %v141_v27  ;;  %v356_v14 = vsel %vm137_vm0, %v342_v10, 0.0  ;;  %v316_v27 = vld [vmem:[#allocation8 + $0xf0] sm:$0xff] }
  0x4f   :  { %v336_v24 = vrot.slane %v328_v21, %v1562_v6 }
  0x51   :  { %v343_v29 = vmul.f32 %v336_v24, %v314_v26 }
  0x52   :  { %154 = vadd.xlane.f32.xlu1 %v153_v30  ;;  %151 = vadd.xlane.f32.xlu0 %v150_v32  ;;  %v315_v30 = vld [vmem:[#allocation8 + $0xe8] sm:$0xff] }
  0x53   :  { %v359_v32 = vsel %vm137_vm0, %v343_v29, 0.0 }
  0x56   :  { %160 = vadd.xlane.f32.xlu1 %v159_v34  ;;  %157 = vadd.xlane.f32.xlu0 %v156_v35  ;;  %v317_v35 = vld [vmem:[#allocation8 + $0xf8] sm:$0xff] }
  0x57   :  { %v346_v37 = vmul.f32 %v336_v24, %v317_v35 }
  0x59   :  { %v368_v38 = vsel %vm137_vm0, %v346_v37, 0.0 }
  0x67   :  { %172 = vrot.lane.b32.xlu1 %v130_v20, %s1505_s2 }
  0x6b   :  { %174 = vrot.lane.b32.xlu1 %v131_v15, %s1505_s2 }
  0x6c   :  { %170 = vrot.lane.b32.xlu0 %v129_v18, %s1505_s2 }
  0x6f   :  { %176 = vrot.lane.b32.xlu1 %v132_v16, %s1505_s2 }
  0x70   :  { %178 = vrot.lane.b32.xlu0 %v133_v28, %s1505_s2 }
  0x73   :  { %180 = vrot.lane.b32.xlu1 %v134_v25, %s1505_s2 }
  0x74   :  { %182 = vrot.lane.b32.xlu0 %v135_v33, %s1505_s2  ;;  %v344_v33 = vmul.f32 %v336_v24, %v315_v30 }
  0x76   :  { %v362_v34 = vsel %vm137_vm0, %v344_v33, 0.0 }
  0x77   :  { %184 = vrot.lane.b32.xlu1 %v136_v31, %s1505_s2  ;;  %v345_v31 = vmul.f32 %v336_v24, %v316_v27  ;;  %v108_v24 = vld [vmem:[#allocation10 + $0xd0] sm:$0xff]  ;;  %v109_v27 = vld [vmem:[#allocation10 + $0xd8] sm:$0xff] }
  0x79   :  { %v365_v36 = vsel %vm137_vm0, %v345_v31, 0.0 }
  0x7b   :  { %264 = vrot.lane.b32.xlu1 %v1597_v42, %s1505_s2 }
  0x93   :  { %254 = vadd.xlane.f32.xlu0 %v253_v46 }
  0x97   :  { %348 = vadd.xlane.f32.xlu0 %v347_v49  ;;  %v1663_v49 = vand.u32 127, %v91_v0 }
  0x99   :  { %vm93_vm2 = vcmp.lt.s32.totalorder %v1663_v49, 64 }
  0x9b   :  { %351 = vadd.xlane.f32.xlu0 %v350_v52 }
  0x9f   :  { %354 = vadd.xlane.f32.xlu0 %v353_v54  ;;  %v102_v54 = vld [vmem:[#allocation10] sm:$0xff] }
  0xd3   :  { %v1614_v55 = vpop.xlane.xlu1 %145  ;;  %v1622_v59 = vpop.xlane.xlu0 %139 }
  0xd7   :  { %v1616_v56 = vpop.xlane.xlu1 %148  ;;  %v1625_v62 = vpop.xlane.xlu0 %142 }
  0xdb   :  { %v1618_v57 = vpop.xlane.xlu1 %154  ;;  %v1627_v2 = vpop.xlane.xlu0 %151 }
  0xdf   :  { %v1620_v58 = vpop.xlane.xlu1 %160  ;;  %v1630_v9 = vpop.xlane.xlu0 %157 }
  0xe3   :  { %v173_v60 = vpop.permute.xlu1 %172  ;;  %v171_v16 = vpop.permute.xlu0 %170 }
  0xe4   :  { %v197_v61 = vsel %vm137_vm0, %v173_v60, 0.0  ;;  %v194_v18 = vsel %vm137_vm0, %v171_v16, 0.0 }
  0xe5   :  { %198 = vadd.xlane.f32.xlu1 %v197_v61 }
  0xe7   :  { %v175_v63 = vpop.permute.xlu1 %174  ;;  %v179_v20 = vpop.permute.xlu0 %178 }
  0xe8   :  { %v200_v19 = vsel %vm137_vm0, %v175_v63, 0.0  ;;  %v206_v23 = vsel %vm137_vm0, %v179_v20, 0.0  ;;  %v103_v63 = vld [vmem:[#allocation10 + $0x8] sm:$0xff] }
  0xe9   :  { %v107_v20 = vld [vmem:[#allocation10 + $0xc8] sm:$0xff] }
  0xeb   :  { %v177_v1 = vpop.permute.xlu1 %176  ;;  %v183_v25 = vpop.permute.xlu0 %182 }
  0xec   :  { %v203_v22 = vsel %vm137_vm0, %v177_v1, 0.0  ;;  %v212_v28 = vsel %vm137_vm0, %v183_v25, 0.0  ;;  %v104_v1 = vld [vmem:[#allocation10 + $0x10] sm:$0xff] }
  0xef   :  { %v181_v3 = vpop.permute.xlu1 %180 }
  0xf0   :  { %v209_v7 = vsel %vm137_vm0, %v181_v3, 0.0 }
  0xf1   :  { %210 = vadd.xlane.f32.xlu1 %v209_v7 }
  0xf3   :  { %v185_v11 = vpop.permute.xlu1 %184 }
  0xf4   :  { %v215_v12 = vsel %vm137_vm0, %v185_v11, 0.0 }
  0xf5   :  { %216 = vadd.xlane.f32.xlu1 %v215_v12  ;;  %v105_v12 = vld [vmem:[#allocation10 + $0x18] sm:$0xff] }
  0xf7   :  { %v265_v15 = vpop.permute.xlu1 %264 }
  0xf8   :  { %v267_v17 = vsel %vm252_vm1, %v265_v15, 0.0 }
  0xf9   :  { %357 = vadd.xlane.f32.xlu1 %v356_v14  ;;  %268 = vadd.xlane.f32.xlu0 %v267_v17 }
  0xfd   :  { %195 = vadd.xlane.f32.xlu0 %v194_v18  ;;  %v106_v18 = vld [vmem:[#allocation10 + $0xc0] sm:$0xff] }
 0x101   :  { %201 = vadd.xlane.f32.xlu0 %v200_v19 }
 0x105   :  { %204 = vadd.xlane.f32.xlu0 %v203_v22 }
 0x109   :  { %207 = vadd.xlane.f32.xlu0 %v206_v23 }
 0x10a   :  { %381 = vrot.lane.b32.xlu1 %v340_v50, %s1505_s2 }
 0x10d   :  { %213 = vadd.xlane.f32.xlu0 %v212_v28 }
 0x10e   :  { %391 = vrot.lane.b32.xlu1 %v345_v31, %s1505_s2 }
 0x111   :  { %360 = vadd.xlane.f32.xlu0 %v359_v32 }
 0x115   :  { %363 = vadd.xlane.f32.xlu0 %v362_v34 }
 0x119   :  { %366 = vadd.xlane.f32.xlu0 %v365_v36 }
 0x11c   :  { %v255_v39 = vpop.xlane.xlu0 %254 }
 0x11d   :  { %369 = vadd.xlane.f32.xlu0 %v368_v38 }
 0x120   :  { %v1656_v43 = vpop.xlane.xlu0 %348 }
 0x124   :  { %v1658_v45 = vpop.xlane.xlu0 %351 }
 0x128   :  { %v1660_v48 = vpop.xlane.xlu0 %354 }
 0x133   :  { %379 = vrot.lane.b32.xlu0 %v1605_v47, %s1505_s2 }
 0x137   :  { %383 = vrot.lane.b32.xlu0 %v1610_v53, %s1505_s2 }
 0x13b   :  { %385 = vrot.lane.b32.xlu0 %v342_v10, %s1505_s2 }
 0x13f   :  { %387 = vrot.lane.b32.xlu0 %v343_v29, %s1505_s2 }
 0x143   :  { %389 = vrot.lane.b32.xlu0 %v344_v33, %s1505_s2 }
 0x147   :  { %393 = vrot.lane.b32.xlu0 %v346_v37, %s1505_s2 }
 0x16e   :  { %v199_v44 = vpop.xlane.xlu1 %198 }
 0x16f   :  { %v219_v0 = vsel %vm93_vm2, %v1625_v62, %v199_v44  ;;  %v1697_v44 = vld [vmem:[#allocation7] sm:$0xff] }
 0x170   :  { %v227_v10 = vmul.f32 %v219_v0, %v103_v63 }
 0x17a   :  { %v211_v46 = vpop.xlane.xlu1 %210 }
 0x17b   :  { %v223_v21 = vsel %vm93_vm2, %v1618_v57, %v211_v46 }
 0x17c   :  { %v231_v25 = vmul.f32 %v223_v21, %v107_v20 }
 0x17e   :  { %v217_v47 = vpop.xlane.xlu1 %216 }
 0x17f   :  { %v225_v28 = vsel %vm93_vm2, %v1620_v58, %v217_v47 }
 0x180   :  { %v233_v31 = vmul.f32 %v225_v28, %v109_v27  ;;  %v519_v28 = vld [vmem:[#allocation8 + $0x58] sm:$0xff] }
 0x182   :  { %v1665_v50 = vpop.xlane.xlu1 %357  ;;  %v269_v51 = vpop.xlane.xlu0 %268 }
 0x183   :  { %v270_v58 = vsel %vm93_vm2, %v255_v39, %v269_v51 }
 0x186   :  { %v382_v52 = vpop.permute.xlu1 %381  ;;  %v196_v53 = vpop.xlane.xlu0 %195 }
 0x187   :  { %v218_v60 = vsel %vm93_vm2, %v1622_v59, %v196_v53  ;;  %v406_v61 = vsel %vm137_vm0, %v382_v52, 0.0  ;;  %v271_v52 = vmul.f32 %v270_v58, %v1697_v44 }
 0x188   :  { %407 = vadd.xlane.f32.xlu0 %v406_v61  ;;  %v226_v3 = vmul.f32 %v218_v60, %v102_v54 }
 0x189   :  { %v273_v63 = vrot.slane %v271_v52, 1 }
 0x18a   :  { %v202_v4 = vpop.xlane.xlu0 %201  ;;  %v234_v14 = vadd.f32 %v227_v10, %v226_v3 }
 0x18b   :  { %v220_v7 = vsel %vm93_vm2, %v1614_v55, %v202_v4 }
 0x18c   :  { %v228_v11 = vmul.f32 %v220_v7, %v104_v1 }
 0x18e   :  { %v205_v59 = vpop.xlane.xlu0 %204  ;;  %v235_v16 = vadd.f32 %v234_v14, %v228_v11 }
 0x18f   :  { %v221_v15 = vsel %vm93_vm2, %v1616_v56, %v205_v59 }
 0x190   :  { %v229_v17 = vmul.f32 %v221_v15, %v105_v12 }
 0x192   :  { %v236_v62 = vadd.f32 %v235_v16, %v229_v17  ;;  %v208_v19 = vpop.xlane.xlu0 %207 }
 0x193   :  { %v222_v55 = vsel %vm93_vm2, %v1627_v2, %v208_v19  ;;  %v392_v19 = vpop.permute.xlu1 %391 }
 0x194   :  { %v237_v22 = vrot.slane %v236_v62, 4  ;;  %v230_v23 = vmul.f32 %v222_v55, %v106_v18  ;;  %v421_v21 = vsel %vm137_vm0, %v392_v19, 0.0 }
 0x196   :  { %v238_v26 = vadd.f32 %v237_v22, %v236_v62  ;;  %v214_v56 = vpop.xlane.xlu0 %213  ;;  %v243_v57 = vadd.f32 %v231_v25, %v230_v23  ;;  %v461_v25 = vcombine.high %v1597_v42, %v1597_v42  ;;  %v534_v42 = vrot.slane %v1571_v13, 2 }
 0x197   :  { %v224_v29 = vsel %vm93_vm2, %v1630_v9, %v214_v56  ;;  %v533_v56 = vrot.slane %v1565_v8, 2 }
 0x198   :  { %v232_v30 = vmul.f32 %v224_v29, %v108_v24  ;;  %v239_v32 = vrot.slane %v238_v26, 2 }
 0x199   :  { %v538_v27 = vrot.slane %v533_v56, %v1562_v6 }
 0x19a   :  { %v244_v2 = vadd.f32 %v243_v57, %v232_v30  ;;  %v1693_v33 = vpop.xlane.xlu0 %360  ;;  %v240_v35 = vadd.f32 %v239_v32, %v238_v26  ;;  %v463_v26 = vsel %vm252_vm1, %v461_v25, 0.0  ;;  %v517_v30 = vld [vmem:[#allocation8 + $0x48] sm:$0xff]  ;;  %v522_v32 = vld [vmem:[#allocation8 + $0x110] sm:$0xff] }
 0x19b   :  { %v1725_v29 = vmul.f32 %v538_v27, %v519_v28 }
 0x19c   :  { %v245_v34 = vadd.f32 %v244_v2, %v233_v31  ;;  %v241_v46 = vrot.slane %v240_v35, 1  ;;  %v546_v31 = vmul.f32 %v538_v27, %v517_v30  ;;  %v1732_v2 = vrot.slane %v534_v42, %v1562_v6  ;;  %v521_v42 = vld [vmem:[#allocation8 + $0x108] sm:$0xff] }
 0x19d   :  { %v562_v57 = vsel %vm137_vm0, %v1725_v29, 0.0 }
 0x19e   :  { %v246_v36 = vrot.slane %v245_v34, 4  ;;  %v1695_v37 = vpop.xlane.xlu0 %363  ;;  %v242_v54 = vadd.f32 %v241_v46, %v240_v35  ;;  %v320_v46 = vld [vmem:[#allocation10 + $0x28] sm:$0xff]  ;;  %v556_v56 = vsel %vm137_vm0, %v546_v31, 0.0 }
 0x1a0   :  { %v247_v38 = vadd.f32 %v246_v36, %v245_v34  ;;  %v276_v1 = vadd.f32 %v271_v52, %v242_v54  ;;  %v551_v34 = vmul.f32 %v1732_v2, %v522_v32  ;;  %v321_v52 = vld [vmem:[#allocation10 + $0x30] sm:$0xff] }
 0x1a2   :  { %v248_v9 = vrot.slane %v247_v38, 2  ;;  %v1701_v47 = vpop.xlane.xlu0 %366  ;;  %v286_v51 = vrot.slane %v276_v1, %v1588_v40  ;;  %v322_v1 = vld [vmem:[#allocation10 + $0x38] sm:$0xff] }
 0x1a4   :  { %v249_v53 = vadd.f32 %v248_v9, %v247_v38  ;;  %v319_v38 = vld [vmem:[#allocation10 + $0x20] sm:$0xff] }
 0x1a6   :  { %v250_v60 = vrot.slane %v249_v53, 1  ;;  %v1704_v61 = vpop.xlane.xlu0 %369 }
 0x1a8   :  { %v251_v0 = vadd.f32 %v250_v60, %v249_v53 }
 0x1aa   :  { %v277_v3 = vadd.f32 %v273_v63, %v251_v0  ;;  %v380_v4 = vpop.permute.xlu0 %379 }
 0x1ab   :  { %v403_v7 = vsel %vm137_vm0, %v380_v4, 0.0 }
 0x1ac   :  { %v293_v39 = vrot.slane %v277_v3, %v1588_v40  ;;  %404 = vadd.xlane.f32.xlu1 %v403_v7 }
 0x1ae   :  { %v298_v10 = vrot.slane %v293_v39, 7  ;;  %v384_v11 = vpop.permute.xlu0 %383 }
 0x1af   :  { %v409_v12 = vsel %vm137_vm0, %v384_v11, 0.0 }
 0x1b0   :  { %410 = vadd.xlane.f32.xlu0 %v409_v12  ;;  %v300_v14 = vsel %vm299_vm3, %v298_v10, %v286_v51  ;;  %v324_v12 = vld [vmem:[#allocation10 + $0xe8] sm:$0xff] }
 0x1b1   :  { %v302_v59 = vsel %vm301_vm4, %v298_v10, %v300_v14 }
 0x1b2   :  { %v386_v15 = vpop.permute.xlu0 %385  ;;  %v304_v16 = vsel %vm303_vm5, %v298_v10, %v302_v59 }
 0x1b3   :  { %v412_v17 = vsel %vm137_vm0, %v386_v15, 0.0  ;;  %v306_v18 = vsel %vm305_vm6, %v298_v10, %v304_v16  ;;  %v323_v10 = vld [vmem:[#allocation10 + $0xe0] sm:$0xff]  ;;  %v325_v15 = vld [vmem:[#allocation10 + $0xf0] sm:$0xff] }
 0x1b4   :  { %413 = vadd.xlane.f32.xlu1 %v412_v17  ;;  %308 = vst [vmem:[#allocation11] sm:$0x3] %v306_v18  ;;  %v326_v18 = vld [vmem:[#allocation10 + $0xf8] sm:$0xff] }
 0x1b6   :  { %v388_v62 = vpop.permute.xlu0 %387 }
 0x1b7   :  { %v415_v20 = vsel %vm137_vm0, %v388_v62, 0.0 }
 0x1b8   :  { %416 = vadd.xlane.f32.xlu0 %v415_v20 }
 0x1ba   :  { %v390_v55 = vpop.permute.xlu0 %389 }
 0x1bb   :  { %v418_v22 = vsel %vm137_vm0, %v390_v55, 0.0 }
 0x1bc   :  { %422 = vadd.xlane.f32.xlu0 %v421_v21  ;;  %419 = vadd.xlane.f32.xlu1 %v418_v22  ;;  %v516_v21 = vld [vmem:[#allocation8 + $0x40] sm:$0xff] }
 0x1be   :  { %v394_v23 = vpop.permute.xlu0 %393 }
 0x1bf   :  { %v424_v24 = vsel %vm137_vm0, %v394_v23, 0.0  ;;  %v545_v23 = vmul.f32 %v538_v27, %v516_v21 }
 0x1c0   :  { %425 = vadd.xlane.f32.xlu1 %v424_v24  ;;  %464 = vadd.xlane.f32.xlu0 %v463_v26  ;;  %v518_v26 = vld [vmem:[#allocation8 + $0x50] sm:$0xff] }
 0x1c1   :  { %v547_v28 = vmul.f32 %v538_v27, %v518_v26 }
 0x1c3   :  { %v559_v30 = vsel %vm137_vm0, %v547_v28, 0.0 }
 0x1d1   :  { %466 = vrot.lane.b32.xlu1 %v461_v25, %s1505_s2 }
 0x1f5   :  { %563 = vadd.xlane.f32.xlu1 %v562_v57  ;;  %v520_v57 = vld [vmem:[#allocation8 + $0x100] sm:$0xff] }
 0x206   :  { %587 = vrot.lane.b32.xlu1 %v546_v31, %s1505_s2  ;;  %v571_v31 = vsel %vm137_vm0, %v551_v34, 0.0 }
 0x20a   :  { %597 = vrot.lane.b32.xlu1 %v551_v34, %s1505_s2 }
 0x211   :  { %v408_v35 = vpop.xlane.xlu0 %407 }
 0x212   :  { %v428_v9 = vsel %vm93_vm2, %v1658_v45, %v408_v35  ;;  %v550_v35 = vmul.f32 %v1732_v2, %v521_v42 }
 0x213   :  { %v436_v63 = vmul.f32 %v428_v9, %v320_v46 }
 0x235   :  { %v405_v36 = vpop.xlane.xlu1 %404 }
 0x236   :  { %v427_v58 = vsel %vm93_vm2, %v1656_v43, %v405_v36  ;;  %v568_v36 = vsel %vm137_vm0, %v550_v35, 0.0 }
 0x237   :  { %v435_v53 = vmul.f32 %v427_v58, %v319_v38  ;;  %v523_v38 = vld [vmem:[#allocation8 + $0x118] sm:$0xff] }
 0x238   :  { %v552_v27 = vmul.f32 %v1732_v2, %v523_v38  ;;  %v667_v38 = vcombine.high %v1591_v41, %v1591_v41 }
 0x239   :  { %v411_v54 = vpop.xlane.xlu0 %410  ;;  %v443_v3 = vadd.f32 %v436_v63, %v435_v53 }
 0x23a   :  { %v429_v60 = vsel %vm93_vm2, %v1660_v48, %v411_v54  ;;  %v574_v58 = vsel %vm137_vm0, %v552_v27, 0.0 }
 0x23b   :  { %v437_v0 = vmul.f32 %v429_v60, %v321_v52 }
 0x23d   :  { %v414_v4 = vpop.xlane.xlu1 %413  ;;  %v444_v7 = vadd.f32 %v443_v3, %v437_v0 }
 0x23e   :  { %v430_v43 = vsel %vm93_vm2, %v1665_v50, %v414_v4 }
 0x23f   :  { %v438_v39 = vmul.f32 %v430_v43, %v322_v1 }
 0x241   :  { %v445_v51 = vadd.f32 %v444_v7, %v438_v39  ;;  %v417_v45 = vpop.xlane.xlu0 %416 }
 0x242   :  { %v431_v11 = vsel %vm93_vm2, %v1693_v33, %v417_v45 }
 0x243   :  { %v439_v16 = vmul.f32 %v431_v11, %v323_v10  ;;  %v446_v9 = vrot.slane %v445_v51, 4 }
 0x245   :  { %v420_v48 = vpop.xlane.xlu1 %419  ;;  %v423_v14 = vpop.xlane.xlu0 %422  ;;  %v447_v53 = vadd.f32 %v446_v9, %v445_v51 }
 0x246   :  { %v432_v59 = vsel %vm93_vm2, %v1695_v37, %v420_v48  ;;  %v433_v50 = vsel %vm93_vm2, %v1701_v47, %v423_v14  ;;  %v553_v47 = vsel %vm137_vm0, %v545_v23, 0.0 }
 0x247   :  { %v440_v17 = vmul.f32 %v432_v59, %v324_v12  ;;  %v441_v19 = vmul.f32 %v433_v50, %v325_v15  ;;  %v448_v60 = vrot.slane %v447_v53, 2 }
 0x249   :  { %v452_v62 = vadd.f32 %v440_v17, %v439_v16  ;;  %v426_v20 = vpop.xlane.xlu1 %425  ;;  %v465_v0 = vpop.xlane.xlu0 %464  ;;  %v449_v3 = vadd.f32 %v448_v60, %v447_v53  ;;  %v734_v60 = vld [vmem:[#allocation8 + $0x130] sm:$0xff] }
 0x24a   :  { %v434_v33 = vsel %vm93_vm2, %v1704_v61, %v426_v20  ;;  %v549_v61 = vmul.f32 %v1732_v2, %v520_v57 }
 0x24b   :  { %v453_v55 = vadd.f32 %v452_v62, %v441_v19  ;;  %v442_v22 = vmul.f32 %v434_v33, %v326_v18  ;;  %v450_v43 = vrot.slane %v449_v3, 1 }
 0x24c   :  { %v565_v32 = vsel %vm137_vm0, %v549_v61, 0.0 }
 0x24d   :  { %v454_v37 = vadd.f32 %v453_v55, %v442_v22  ;;  %v467_v24 = vpop.permute.xlu1 %466  ;;  %v451_v11 = vadd.f32 %v450_v43, %v449_v3  ;;  %v527_v43 = vld [vmem:[#allocation10 + $0x50] sm:$0xff] }
 0x24e   :  { %v469_v25 = vsel %vm252_vm1, %v467_v24, 0.0 }
 0x24f   :  { %470 = vadd.xlane.f32.xlu0 %v469_v25  ;;  %v455_v52 = vrot.slane %v454_v37, 4 }
 0x251   :  { %v456_v54 = vadd.f32 %v455_v52, %v454_v37  ;;  %v729_v52 = vld [vmem:[#allocation8 + $0x68] sm:$0xff] }
 0x253   :  { %554 = vadd.xlane.f32.xlu0 %v553_v47  ;;  %v457_v63 = vrot.slane %v456_v54, 2 }
 0x255   :  { %v458_v1 = vadd.f32 %v457_v63, %v456_v54  ;;  %v746_v54 = vrot.slane %v1571_v13, 3 }
 0x257   :  { %557 = vadd.xlane.f32.xlu0 %v556_v56  ;;  %v459_v7 = vrot.slane %v458_v1, 1  ;;  %v1824_v63 = vrot.slane %v746_v54, %v1562_v6 }
 0x259   :  { %v460_v12 = vadd.f32 %v459_v7, %v458_v1  ;;  %v525_v1 = vld [vmem:[#allocation10 + $0x40] sm:$0xff] }
 0x25b   :  { %560 = vadd.xlane.f32.xlu0 %v559_v30 }
 0x25f   :  { %566 = vadd.xlane.f32.xlu0 %v565_v32 }
 0x263   :  { %569 = vadd.xlane.f32.xlu0 %v568_v36 }
 0x267   :  { %572 = vadd.xlane.f32.xlu0 %v571_v31  ;;  %v1809_v31 = vrot.slane %v667_v38, %v1588_v40 }
 0x26b   :  { %575 = vadd.xlane.f32.xlu0 %v574_v58  ;;  %v745_v58 = vrot.slane %v1565_v8, 3  ;;  %v763_v8 = vmul.f32 %v1824_v63, %v734_v60 }
 0x27e   :  { %v1778_v34 = vpop.xlane.xlu1 %563 }
 0x281   :  { %585 = vrot.lane.b32.xlu0 %v545_v23, %s1505_s2 }
 0x282   :  { %v588_v2 = vpop.permute.xlu1 %587 }
 0x283   :  { %v612_v46 = vsel %vm137_vm0, %v588_v2, 0.0  ;;  %v750_v2 = vrot.slane %v745_v58, %v1562_v6  ;;  %v732_v58 = vld [vmem:[#allocation8 + $0x120] sm:$0xff] }
 0x285   :  { %589 = vrot.lane.b32.xlu0 %v547_v28, %s1505_s2  ;;  %v758_v53 = vmul.f32 %v750_v2, %v729_v52 }
 0x286   :  { %v598_v57 = vpop.permute.xlu1 %597 }
 0x287   :  { %v768_v38 = vsel %vm137_vm0, %v758_v53, 0.0 }
 0x289   :  { %591 = vrot.lane.b32.xlu0 %v1725_v29, %s1505_s2  ;;  %v480_v29 = vrot.slane %v1697_v44, %v1588_v40 }
 0x28b   :  { %v481_v4 = vcombine.high %v480_v29, %v480_v29 }
 0x28d   :  { %593 = vrot.lane.b32.xlu0 %v549_v61, %s1505_s2  ;;  %v627_v61 = vsel %vm137_vm0, %v598_v57, 0.0  ;;  %v728_v57 = vld [vmem:[#allocation8 + $0x60] sm:$0xff] }
 0x291   :  { %595 = vrot.lane.b32.xlu0 %v550_v35, %s1505_s2 }
 0x295   :  { %599 = vrot.lane.b32.xlu0 %v552_v27, %s1505_s2  ;;  %v676_v27 = vsel %vm252_vm1, %v1809_v31, 0.0 }
 0x2b4   :  { %613 = vadd.xlane.f32.xlu0 %v612_v46  ;;  %v731_v46 = vld [vmem:[#allocation8 + $0x78] sm:$0xff] }
 0x2b5   :  { %v1817_v9 = vmul.f32 %v750_v2, %v731_v46 }
 0x2b7   :  { %v774_v41 = vsel %vm137_vm0, %v1817_v9, 0.0 }
 0x2d8   :  { %v471_v39 = vpop.xlane.xlu0 %470 }
 0x2d9   :  { %v472_v45 = vsel %vm93_vm2, %v465_v0, %v471_v39 }
 0x2da   :  { %v483_v10 = vmul.f32 %v481_v4, %v472_v45  ;;  %v526_v4 = vld [vmem:[#allocation10 + $0x48] sm:$0xff] }
 0x2dc   :  { %v485_v51 = vrot.slane %v483_v10, 1  ;;  %v555_v48 = vpop.xlane.xlu0 %554  ;;  %v488_v14 = vadd.f32 %v483_v10, %v451_v11 }
 0x2de   :  { %v489_v59 = vadd.f32 %v485_v51, %v460_v12  ;;  %v498_v16 = vrot.slane %v488_v14, %v1588_v40  ;;  %v528_v12 = vld [vmem:[#allocation10 + $0x58] sm:$0xff] }
 0x2e0   :  { %v505_v15 = vrot.slane %v489_v59, %v1588_v40  ;;  %v558_v50 = vpop.xlane.xlu0 %557 }
 0x2e2   :  { %v508_v17 = vrot.slane %v505_v15, 7 }
 0x2e4   :  { %v509_v18 = vsel %vm299_vm3, %v508_v17, %v498_v16  ;;  %v561_v62 = vpop.xlane.xlu0 %560 }
 0x2e5   :  { %v510_v19 = vsel %vm301_vm4, %v508_v17, %v509_v18 }
 0x2e6   :  { %v511_v20 = vsel %vm303_vm5, %v508_v17, %v510_v19  ;;  %v530_v19 = vld [vmem:[#allocation10 + $0x108] sm:$0xff] }
 0x2e7   :  { %v512_v21 = vsel %vm305_vm6, %v508_v17, %v511_v20 }
 0x2e8   :  { %v1791_v33 = vpop.xlane.xlu0 %566  ;;  %514 = vst [vmem:[#allocation11 + $0x2] sm:$0x3] %v512_v21 }
 0x2ec   :  { %v1793_v55 = vpop.xlane.xlu0 %569 }
 0x2f0   :  { %v1795_v22 = vpop.xlane.xlu0 %572 }
 0x2f4   :  { %v1797_v23 = vpop.xlane.xlu0 %575 }
 0x2f8   :  { %v586_v37 = vpop.permute.xlu0 %585 }
 0x2f9   :  { %v609_v24 = vsel %vm137_vm0, %v586_v37, 0.0  ;;  %v531_v37 = vld [vmem:[#allocation10 + $0x110] sm:$0xff] }
 0x2fa   :  { %610 = vadd.xlane.f32.xlu1 %v609_v24 }
 0x2fc   :  { %v590_v25 = vpop.permute.xlu0 %589 }
 0x2fd   :  { %v615_v47 = vsel %vm137_vm0, %v590_v25, 0.0 }
 0x2fe   :  { %616 = vadd.xlane.f32.xlu0 %v615_v47  ;;  %v532_v47 = vld [vmem:[#allocation10 + $0x118] sm:$0xff] }
 0x300   :  { %v592_v26 = vpop.permute.xlu0 %591 }
 0x301   :  { %v618_v56 = vsel %vm137_vm0, %v592_v26, 0.0 }
 0x302   :  { %619 = vadd.xlane.f32.xlu1 %v618_v56 }
 0x304   :  { %v594_v28 = vpop.permute.xlu0 %593 }
 0x305   :  { %v621_v30 = vsel %vm137_vm0, %v594_v28, 0.0 }
 0x306   :  { %622 = vadd.xlane.f32.xlu0 %v621_v30 }
 0x308   :  { %v596_v42 = vpop.permute.xlu0 %595 }
 0x309   :  { %v624_v32 = vsel %vm137_vm0, %v596_v42, 0.0  ;;  %v757_v42 = vmul.f32 %v750_v2, %v728_v57 }
 0x30a   :  { %628 = vadd.xlane.f32.xlu0 %v627_v61  ;;  %625 = vadd.xlane.f32.xlu1 %v624_v32 }
 0x30c   :  { %v600_v35 = vpop.permute.xlu0 %599 }
 0x30d   :  { %v630_v36 = vsel %vm137_vm0, %v600_v35, 0.0 }
 0x30e   :  { %631 = vadd.xlane.f32.xlu1 %v630_v36  ;;  %677 = vadd.xlane.f32.xlu0 %v676_v27  ;;  %v730_v36 = vld [vmem:[#allocation8 + $0x70] sm:$0xff] }
 0x30f   :  { %v759_v27 = vmul.f32 %v750_v2, %v730_v36 }
 0x311   :  { %v771_v46 = vsel %vm137_vm0, %v759_v27, 0.0 }
 0x31f   :  { %679 = vrot.lane.b32.xlu1 %v1809_v31, %s1505_s2 }
 0x33d   :  { %v614_v0 = vpop.xlane.xlu0 %613 }
 0x33e   :  { %v634_v13 = vsel %vm93_vm2, %v558_v50, %v614_v0  ;;  %v529_v50 = vld [vmem:[#allocation10 + $0x100] sm:$0xff]  ;;  %v735_v0 = vld [vmem:[#allocation8 + $0x138] sm:$0xff] }
 0x33f   :  { %v642_v10 = vmul.f32 %v634_v13, %v526_v4  ;;  %v764_v2 = vmul.f32 %v1824_v63, %v735_v0 }
 0x343   :  { %775 = vadd.xlane.f32.xlu1 %v774_v41  ;;  %v733_v41 = vld [vmem:[#allocation8 + $0x128] sm:$0xff] }
 0x344   :  { %v762_v54 = vmul.f32 %v1824_v63, %v733_v41 }
 0x346   :  { %v780_v60 = vsel %vm137_vm0, %v762_v54, 0.0 }
 0x354   :  { %799 = vrot.lane.b32.xlu1 %v758_v53, %s1505_s2  ;;  %v783_v53 = vsel %vm137_vm0, %v763_v8, 0.0 }
 0x358   :  { %809 = vrot.lane.b32.xlu1 %v763_v8, %s1505_s2 }
 0x383   :  { %v611_v29 = vpop.xlane.xlu1 %610 }
 0x384   :  { %v633_v3 = vsel %vm93_vm2, %v555_v48, %v611_v29  ;;  %v786_v29 = vsel %vm137_vm0, %v764_v2, 0.0 }
 0x385   :  { %v641_v7 = vmul.f32 %v633_v3, %v525_v1 }
 0x387   :  { %v617_v39 = vpop.xlane.xlu0 %616  ;;  %v649_v51 = vadd.f32 %v642_v10, %v641_v7 }
 0x388   :  { %v635_v45 = vsel %vm93_vm2, %v561_v62, %v617_v39 }
 0x389   :  { %v643_v11 = vmul.f32 %v635_v45, %v527_v43 }
 0x38b   :  { %v620_v14 = vpop.xlane.xlu1 %619  ;;  %v650_v48 = vadd.f32 %v649_v51, %v643_v11 }
 0x38c   :  { %v636_v59 = vsel %vm93_vm2, %v1778_v34, %v620_v14 }
 0x38d   :  { %v644_v15 = vmul.f32 %v636_v59, %v528_v12 }
 0x38f   :  { %v651_v16 = vadd.f32 %v650_v48, %v644_v15  ;;  %v623_v17 = vpop.xlane.xlu0 %622 }
 0x390   :  { %v637_v18 = vsel %vm93_vm2, %v1791_v33, %v623_v17 }
 0x391   :  { %v645_v24 = vmul.f32 %v637_v18, %v529_v50  ;;  %v652_v3 = vrot.slane %v651_v16, 4 }
 0x393   :  { %v626_v62 = vpop.xlane.xlu1 %625  ;;  %v629_v20 = vpop.xlane.xlu0 %628  ;;  %v653_v13 = vadd.f32 %v652_v3, %v651_v16 }
 0x394   :  { %v638_v21 = vsel %vm93_vm2, %v1793_v55, %v626_v62  ;;  %v639_v34 = vsel %vm93_vm2, %v1795_v22, %v629_v20  ;;  %v765_v22 = vsel %vm137_vm0, %v757_v42, 0.0 }
 0x395   :  { %v646_v25 = vmul.f32 %v638_v21, %v530_v19  ;;  %v647_v56 = vmul.f32 %v639_v34, %v531_v37  ;;  %v654_v7 = vrot.slane %v653_v13, 2 }
 0x397   :  { %v658_v26 = vadd.f32 %v646_v25, %v645_v24  ;;  %v632_v28 = vpop.xlane.xlu1 %631  ;;  %v678_v45 = vpop.xlane.xlu0 %677  ;;  %v655_v11 = vadd.f32 %v654_v7, %v653_v13 }
 0x398   :  { %v640_v33 = vsel %vm93_vm2, %v1797_v23, %v632_v28  ;;  %v761_v23 = vmul.f32 %v1824_v63, %v732_v58 }
 0x399   :  { %v659_v30 = vadd.f32 %v658_v26, %v647_v56  ;;  %v648_v61 = vmul.f32 %v640_v33, %v532_v47  ;;  %v656_v51 = vrot.slane %v655_v11, 1 }
 0x39a   :  { %v777_v52 = vsel %vm137_vm0, %v761_v23, 0.0 }
 0x39b   :  { %v660_v55 = vadd.f32 %v659_v30, %v648_v61  ;;  %v680_v32 = vpop.permute.xlu1 %679  ;;  %v657_v16 = vadd.f32 %v656_v51, %v655_v11  ;;  %v1136_v11 = vld [vmem:[#allocation8 + $0xa8] sm:$0xff] }
 0x39c   :  { %v682_v35 = vsel %vm252_vm1, %v680_v32, 0.0 }
 0x39d   :  { %683 = vadd.xlane.f32.xlu0 %v682_v35  ;;  %v661_v4 = vrot.slane %v660_v55, 4 }
 0x39f   :  { %v662_v43 = vadd.f32 %v661_v4, %v660_v55 }
 0x3a1   :  { %766 = vadd.xlane.f32.xlu0 %v765_v22  ;;  %v663_v39 = vrot.slane %v662_v43, 2 }
 0x3a3   :  { %v664_v10 = vadd.f32 %v663_v39, %v662_v43  ;;  %v1140_v39 = vld [vmem:[#allocation8 + $0x168] sm:$0xff] }
 0x3a5   :  { %769 = vadd.xlane.f32.xlu0 %v768_v38  ;;  %v665_v14 = vrot.slane %v664_v10, 1 }
 0x3a7   :  { %v666_v17 = vadd.f32 %v665_v14, %v664_v10  ;;  %v933_v14 = vld [vmem:[#allocation8 + $0x158] sm:$0xff] }
 0x3a9   :  { %772 = vadd.xlane.f32.xlu0 %v771_v46 }
 0x3ad   :  { %778 = vadd.xlane.f32.xlu0 %v777_v52  ;;  %v879_v52 = vcombine.high %v1809_v31, %v1809_v31  ;;  %v927_v31 = vld [vmem:[#allocation8 + $0x88] sm:$0xff] }
 0x3b1   :  { %781 = vadd.xlane.f32.xlu0 %v780_v60  ;;  %v84_v60 = vld [vmem:[#allocation2 + $0x8] sm:$0xf] }
 0x3b2   :  { %v950_v0 = vrot.slane %v84_v60, %v1560_v5  ;;  %v932_v5 = vld [vmem:[#allocation8 + $0x150] sm:$0xff] }
 0x3b4   :  { %v1919_v3 = vrot.slane %v950_v0, %v1562_v6 }
 0x3b5   :  { %784 = vadd.xlane.f32.xlu0 %v783_v53  ;;  %v951_v53 = vcombine.high %v950_v0, %v950_v0 }
 0x3b6   :  { %v1922_v4 = vmul.f32 %v1919_v3, %v927_v31 }
 0x3b7   :  { %v1153_v43 = vrot.slane %v951_v53, 1 }
 0x3b9   :  { %787 = vadd.xlane.f32.xlu0 %v786_v29  ;;  %v930_v29 = vld [vmem:[#allocation8 + $0x140] sm:$0xff]  ;;  %v1932_v7 = vrot.slane %v1153_v43, %v1562_v6 }
 0x3cc   :  { %v1867_v8 = vpop.xlane.xlu1 %775 }
 0x3cf   :  { %797 = vrot.lane.b32.xlu0 %v757_v42, %s1505_s2 }
 0x3d0   :  { %v800_v63 = vpop.permute.xlu1 %799 }
 0x3d1   :  { %v824_v1 = vsel %vm137_vm0, %v800_v63, 0.0 }
 0x3d3   :  { %801 = vrot.lane.b32.xlu0 %v759_v27, %s1505_s2 }
 0x3d4   :  { %v810_v36 = vpop.permute.xlu1 %809 }
 0x3d5   :  { %v839_v27 = vsel %vm137_vm0, %v810_v36, 0.0 }
 0x3d7   :  { %803 = vrot.lane.b32.xlu0 %v1817_v9, %s1505_s2  ;;  %v686_v9 = vcombine.high %v1697_v44, %v1697_v44 }
 0x3d9   :  { %v1873_v12 = vrot.slane %v686_v9, %v1588_v40  ;;  %v1152_v9 = vrot.slane %v950_v0, 1 }
 0x3db   :  { %805 = vrot.lane.b32.xlu0 %v761_v23, %s1505_s2  ;;  %v1940_v10 = vrot.slane %v1152_v9, %v1562_v6 }
 0x3dd   :  { %v1943_v51 = vmul.f32 %v1940_v10, %v1136_v11  ;;  %v928_v11 = vld [vmem:[#allocation8 + $0x90] sm:$0xff] }
 0x3df   :  { %807 = vrot.lane.b32.xlu0 %v762_v54, %s1505_s2  ;;  %v881_v54 = vsel %vm252_vm1, %v879_v52, 0.0 }
 0x3e3   :  { %811 = vrot.lane.b32.xlu0 %v764_v2, %s1505_s2  ;;  %v1911_v2 = vrot.slane %v951_v53, %v1562_v6  ;;  %v86_v6 = vld [vmem:[#allocation5 + $0x8] sm:$0xf] }
 0x3e5   :  { %v1914_v63 = vmul.f32 %v1911_v2, %v930_v29  ;;  %v1927_v13 = vmul.f32 %v1911_v2, %v932_v5 }
 0x402   :  { %825 = vadd.xlane.f32.xlu0 %v824_v1  ;;  %v982_v1 = vsel %vm137_vm0, %v1914_v63, 0.0 }
 0x426   :  { %v684_v59 = vpop.xlane.xlu0 %683 }
 0x427   :  { %v685_v48 = vsel %vm93_vm2, %v678_v45, %v684_v59  ;;  %v1935_v45 = vmul.f32 %v1932_v7, %v1140_v39  ;;  %v1948_v59 = vmul.f32 %v1911_v2, %v933_v14  ;;  %v973_v14 = vsel %vm137_vm0, %v1922_v4, 0.0 }
 0x428   :  { %v695_v15 = vmul.f32 %v1873_v12, %v685_v48  ;;  %v1142_v48 = vld [vmem:[#allocation8 + $0x178] sm:$0xff] }
 0x42a   :  { %v697_v50 = vrot.slane %v695_v15, 1  ;;  %v1878_v18 = vpop.xlane.xlu0 %766  ;;  %v700_v19 = vadd.f32 %v695_v15, %v657_v16  ;;  %v1953_v15 = vmul.f32 %v1932_v7, %v1142_v48  ;;  %v1957_v16 = vmul.f32 %v86_v6, %v84_v60  ;;  %v744_v60 = vld [vmem:[#allocation10 + $0x138] sm:$0xff] }
 0x42b   :  { %v964_v48 = vmul.f32 %v1919_v3, %v928_v11  ;;  %v929_v6 = vld [vmem:[#allocation8 + $0x98] sm:$0xff] }
 0x42c   :  { %v701_v44 = vadd.f32 %v697_v50, %v666_v17  ;;  %v710_v21 = vrot.slane %v700_v19, %v1588_v40  ;;  %v1961_v17 = vrot.slane %v1957_v16, %v1588_v40 }
 0x42e   :  { %v717_v62 = vrot.slane %v701_v44, %v1588_v40  ;;  %v1881_v20 = vpop.xlane.xlu0 %769  ;;  %v737_v44 = vld [vmem:[#allocation10 + $0x60] sm:$0xff] }
 0x430   :  { %v720_v37 = vrot.slane %v717_v62, 7 }
 0x432   :  { %v721_v34 = vsel %vm299_vm3, %v720_v37, %v710_v21  ;;  %v1885_v24 = vpop.xlane.xlu0 %772  ;;  %v738_v21 = vld [vmem:[#allocation10 + $0x68] sm:$0xff] }
 0x433   :  { %v722_v25 = vsel %vm301_vm4, %v720_v37, %v721_v34  ;;  %v739_v34 = vld [vmem:[#allocation10 + $0x70] sm:$0xff] }
 0x434   :  { %v723_v47 = vsel %vm303_vm5, %v720_v37, %v722_v25 }
 0x435   :  { %v724_v26 = vsel %vm305_vm6, %v720_v37, %v723_v47 }
 0x436   :  { %v1890_v56 = vpop.xlane.xlu0 %778  ;;  %726 = vst [vmem:[#allocation11 + $0x4] sm:$0x3] %v724_v26 }
 0x43a   :  { %v1892_v28 = vpop.xlane.xlu0 %781 }
 0x43e   :  { %v1894_v57 = vpop.xlane.xlu0 %784 }
 0x442   :  { %v1896_v33 = vpop.xlane.xlu0 %787 }
 0x446   :  { %v798_v30 = vpop.permute.xlu0 %797 }
 0x447   :  { %v821_v61 = vsel %vm137_vm0, %v798_v30, 0.0 }
 0x448   :  { %822 = vadd.xlane.f32.xlu1 %v821_v61 }
 0x44a   :  { %v802_v42 = vpop.permute.xlu0 %801 }
 0x44b   :  { %v827_v55 = vsel %vm137_vm0, %v802_v42, 0.0  ;;  %v740_v42 = vld [vmem:[#allocation10 + $0x78] sm:$0xff] }
 0x44c   :  { %828 = vadd.xlane.f32.xlu0 %v827_v55 }
 0x44e   :  { %v804_v32 = vpop.permute.xlu0 %803 }
 0x44f   :  { %v830_v35 = vsel %vm137_vm0, %v804_v32, 0.0 }
 0x450   :  { %831 = vadd.xlane.f32.xlu1 %v830_v35 }
 0x452   :  { %v806_v22 = vpop.permute.xlu0 %805 }
 0x453   :  { %v833_v38 = vsel %vm137_vm0, %v806_v22, 0.0 }
 0x454   :  { %834 = vadd.xlane.f32.xlu0 %v833_v38  ;;  %v741_v38 = vld [vmem:[#allocation10 + $0x120] sm:$0xff] }
 0x456   :  { %v808_v58 = vpop.permute.xlu0 %807 }
 0x457   :  { %v836_v46 = vsel %vm137_vm0, %v808_v58, 0.0 }
 0x458   :  { %840 = vadd.xlane.f32.xlu0 %v839_v27  ;;  %837 = vadd.xlane.f32.xlu1 %v836_v46 }
 0x45a   :  { %v812_v23 = vpop.permute.xlu0 %811 }
 0x45b   :  { %v842_v41 = vsel %vm137_vm0, %v812_v23, 0.0 }
 0x45c   :  { %843 = vadd.xlane.f32.xlu1 %v842_v41  ;;  %882 = vadd.xlane.f32.xlu0 %v881_v54  ;;  %v743_v41 = vld [vmem:[#allocation10 + $0x130] sm:$0xff] }
 0x46d   :  { %884 = vrot.lane.b32.xlu1 %v879_v52, %s1505_s2 }
 0x48b   :  { %v826_v50 = vpop.xlane.xlu0 %825 }
 0x48c   :  { %v846_v37 = vsel %vm93_vm2, %v1881_v20, %v826_v50  ;;  %v965_v50 = vmul.f32 %v1919_v3, %v929_v6 }
 0x48d   :  { %v854_v30 = vmul.f32 %v846_v37, %v738_v21  ;;  %v991_v37 = vsel %vm137_vm0, %v1948_v59, 0.0 }
 0x491   :  { %983 = vadd.xlane.f32.xlu1 %v982_v1  ;;  %v926_v1 = vld [vmem:[#allocation8 + $0x80] sm:$0xff] }
 0x4a2   :  { %1004 = vrot.lane.b32.xlu1 %v1922_v4, %s1505_s2  ;;  %v988_v4 = vsel %vm137_vm0, %v1927_v13, 0.0 }
 0x4a6   :  { %1014 = vrot.lane.b32.xlu1 %v1927_v13, %s1505_s2  ;;  %v1135_v13 = vld [vmem:[#allocation8 + $0xa0] sm:$0xff] }
 0x4aa   :  { %1214 = vrot.lane.b32.xlu1 %v1935_v45, %s1505_s2 }
 0x4ae   :  { %1206 = vrot.lane.b32.xlu1 %v1943_v51, %s1505_s2 }
 0x4b2   :  { %1016 = vrot.lane.b32.xlu1 %v1948_v59, %s1505_s2  ;;  %v2018_v59 = vmul.f32 %v1940_v10, %v1135_v13 }
 0x4b6   :  { %1218 = vrot.lane.b32.xlu1 %v1953_v15, %s1505_s2 }
 0x4ba   :  { %1095 = vrot.lane.b32.xlu1 %v1961_v17, %s1505_s2 }
 0x4d1   :  { %v823_v19 = vpop.xlane.xlu1 %822 }
 0x4d2   :  { %v845_v62 = vsel %vm93_vm2, %v1878_v18, %v823_v19  ;;  %v931_v19 = vld [vmem:[#allocation8 + $0x148] sm:$0xff] }
 0x4d3   :  { %v853_v25 = vmul.f32 %v845_v62, %v737_v44  ;;  %v979_v44 = vsel %vm137_vm0, %v965_v50, 0.0  ;;  %v967_v62 = vmul.f32 %v1911_v2, %v931_v19  ;;  %v1139_v2 = vld [vmem:[#allocation8 + $0x160] sm:$0xff] }
 0x4d5   :  { %v829_v47 = vpop.xlane.xlu0 %828  ;;  %v861_v55 = vadd.f32 %v854_v30, %v853_v25  ;;  %v985_v21 = vsel %vm137_vm0, %v967_v62, 0.0 }
 0x4d6   :  { %v847_v26 = vsel %vm93_vm2, %v1885_v24, %v829_v47  ;;  %v742_v24 = vld [vmem:[#allocation10 + $0x128] sm:$0xff] }
 0x4d7   :  { %v855_v61 = vmul.f32 %v847_v26, %v739_v34  ;;  %v1141_v34 = vld [vmem:[#allocation8 + $0x170] sm:$0xff]  ;;  %v1138_v26 = vld [vmem:[#allocation8 + $0xb8] sm:$0xff] }
 0x4d8   :  { %v2023_v25 = vmul.f32 %v1932_v7, %v1141_v34  ;;  %v2033_v30 = vmul.f32 %v1940_v10, %v1138_v26 }
 0x4d9   :  { %v832_v32 = vpop.xlane.xlu1 %831  ;;  %v862_v35 = vadd.f32 %v861_v55, %v855_v61  ;;  %v2037_v61 = vcombine.high %v1961_v17, %v1961_v17 }
 0x4da   :  { %v848_v18 = vsel %vm93_vm2, %v1867_v8, %v832_v32 }
 0x4db   :  { %v856_v22 = vmul.f32 %v848_v18, %v740_v42 }
 0x4dd   :  { %v1977_v36 = vadd.f32 %v862_v35, %v856_v22  ;;  %v835_v20 = vpop.xlane.xlu0 %834 }
 0x4de   :  { %v849_v27 = vsel %vm93_vm2, %v1890_v56, %v835_v20 }
 0x4df   :  { %v857_v52 = vmul.f32 %v849_v27, %v741_v38  ;;  %v864_v32 = vrot.slane %v1977_v36, 4 }
 0x4e1   :  { %v838_v58 = vpop.xlane.xlu1 %837  ;;  %v841_v46 = vpop.xlane.xlu0 %840 }
 0x4e2   :  { %v850_v23 = vsel %vm93_vm2, %v1892_v28, %v838_v58  ;;  %v851_v8 = vsel %vm93_vm2, %v1894_v57, %v841_v46  ;;  %v962_v28 = vmul.f32 %v1919_v3, %v926_v1  ;;  %v2013_v3 = vmul.f32 %v1932_v7, %v1139_v2 }
 0x4e3   :  { %v858_v54 = vmul.f32 %v850_v23, %v742_v24  ;;  %v859_v53 = vmul.f32 %v851_v8, %v743_v41  ;;  %v891_v24 = vcombine.high %v1873_v12, %v1873_v12 }
 0x4e4   :  { %v970_v57 = vsel %vm137_vm0, %v962_v28, 0.0 }
 0x4e5   :  { %v870_v0 = vadd.f32 %v858_v54, %v857_v52  ;;  %v844_v29 = vpop.xlane.xlu1 %843  ;;  %v883_v20 = vpop.xlane.xlu0 %882 }
 0x4e6   :  { %v852_v56 = vsel %vm93_vm2, %v1896_v33, %v844_v29  ;;  %v976_v33 = vsel %vm137_vm0, %v964_v48, 0.0 }
 0x4e7   :  { %v871_v31 = vadd.f32 %v870_v0, %v859_v53  ;;  %v860_v5 = vmul.f32 %v852_v56, %v744_v60 }
 0x4e9   :  { %v872_v43 = vadd.f32 %v871_v31, %v860_v5  ;;  %v885_v39 = vpop.permute.xlu1 %884 }
 0x4ea   :  { %v887_v9 = vsel %vm252_vm1, %v885_v39, 0.0 }
 0x4eb   :  { %888 = vadd.xlane.f32.xlu0 %v887_v9  ;;  %v873_v18 = vrot.slane %v872_v43, 4 }
 0x4ed   :  { %v874_v35 = vadd.f32 %v873_v18, %v872_v43 }
 0x4ef   :  { %971 = vadd.xlane.f32.xlu0 %v970_v57  ;;  %v875_v22 = vrot.slane %v874_v35, 2 }
 0x4f1   :  { %v876_v38 = vadd.f32 %v875_v22, %v874_v35  ;;  %v1172_v35 = vsel %vm137_vm0, %v2018_v59, 0.0  ;;  %v1175_v22 = vsel %vm137_vm0, %v1943_v51, 0.0 }
 0x4f3   :  { %974 = vadd.xlane.f32.xlu0 %v973_v14  ;;  %v877_v46 = vrot.slane %v876_v38, 1 }
 0x4f5   :  { %v878_v54 = vadd.f32 %v877_v46, %v876_v38  ;;  %v1187_v38 = vsel %vm137_vm0, %v1935_v45, 0.0 }
 0x4f7   :  { %977 = vadd.xlane.f32.xlu0 %v976_v33 }
 0x4fb   :  { %980 = vadd.xlane.f32.xlu0 %v979_v44 }
 0x4ff   :  { %986 = vadd.xlane.f32.xlu0 %v985_v21 }
 0x503   :  { %989 = vadd.xlane.f32.xlu0 %v988_v4 }
 0x507   :  { %992 = vadd.xlane.f32.xlu0 %v991_v37 }
 0x51a   :  { %v2043_v7 = vpop.xlane.xlu1 %983 }
 0x51d   :  { %1002 = vrot.lane.b32.xlu0 %v962_v28, %s1505_s2 }
 0x51e   :  { %v1005_v42 = vpop.permute.xlu1 %1004 }
 0x51f   :  { %v1029_v55 = vsel %vm137_vm0, %v1005_v42, 0.0 }
 0x521   :  { %1006 = vrot.lane.b32.xlu0 %v964_v48, %s1505_s2 }
 0x522   :  { %v1015_v11 = vpop.permute.xlu1 %1014 }
 0x523   :  { %v1044_v42 = vsel %vm137_vm0, %v1015_v11, 0.0 }
 0x525   :  { %1008 = vrot.lane.b32.xlu0 %v965_v50, %s1505_s2 }
 0x526   :  { %v1215_v6 = vpop.permute.xlu1 %1214 }
 0x529   :  { %1010 = vrot.lane.b32.xlu0 %v1914_v63, %s1505_s2  ;;  %v1137_v63 = vld [vmem:[#allocation8 + $0xb0] sm:$0xff] }
 0x52a   :  { %v2028_v47 = vmul.f32 %v1940_v10, %v1137_v63  ;;  %v865_v10 = vadd.f32 %v864_v32, %v1977_v36  ;;  %v1207_v19 = vpop.permute.xlu1 %1206 }
 0x52c   :  { %v866_v17 = vrot.slane %v865_v10, 2  ;;  %v1178_v45 = vsel %vm137_vm0, %v2028_v47, 0.0 }
 0x52d   :  { %1012 = vrot.lane.b32.xlu0 %v967_v62, %s1505_s2 }
 0x52e   :  { %v867_v27 = vadd.f32 %v866_v17, %v865_v10  ;;  %v1017_v4 = vpop.permute.xlu1 %1016  ;;  %v1184_v17 = vsel %vm137_vm0, %v2013_v3, 0.0 }
 0x52f   :  { %v1047_v18 = vsel %vm137_vm0, %v1017_v4, 0.0  ;;  %v939_v4 = vld [vmem:[#allocation10 + $0x140] sm:$0xff] }
 0x530   :  { %v868_v58 = vrot.slane %v867_v27, 1 }
 0x531   :  { %1212 = vrot.lane.b32.xlu0 %v2013_v3, %s1505_s2 }
 0x532   :  { %v869_v52 = vadd.f32 %v868_v58, %v867_v27  ;;  %v1219_v34 = vpop.permute.xlu1 %1218  ;;  %v1231_v58 = vsel %vm137_vm0, %v1207_v19, 0.0 }
 0x535   :  { %1204 = vrot.lane.b32.xlu0 %v2018_v59, %s1505_s2  ;;  %v1190_v59 = vsel %vm137_vm0, %v2023_v25, 0.0 }
 0x536   :  { %v1096_v32 = vpop.permute.xlu1 %1095 }
 0x537   :  { %v1098_v10 = vsel %vm252_vm1, %v1096_v32, 0.0  ;;  %v942_v32 = vld [vmem:[#allocation10 + $0x158] sm:$0xff] }
 0x539   :  { %1216 = vrot.lane.b32.xlu0 %v2023_v25, %s1505_s2 }
 0x53d   :  { %1208 = vrot.lane.b32.xlu0 %v2028_v47, %s1505_s2 }
 0x541   :  { %1210 = vrot.lane.b32.xlu0 %v2033_v30, %s1505_s2 }
 0x545   :  { %1291 = vrot.lane.b32.xlu0 %v2037_v61, %s1505_s2 }
 0x564   :  { %1030 = vadd.xlane.f32.xlu0 %v1029_v55  ;;  %v1084_v55 = vsel %vm252_vm1, %v1957_v16, 0.0 }
 0x574   :  { %v889_v23 = vpop.xlane.xlu0 %888 }
 0x575   :  { %v890_v41 = vsel %vm93_vm2, %v883_v20, %v889_v23 }
 0x576   :  { %v893_v8 = vmul.f32 %v891_v24, %v890_v41  ;;  %v1243_v24 = vsel %vm137_vm0, %v1215_v6, 0.0  ;;  %v1193_v41 = vsel %vm137_vm0, %v1953_v15, 0.0 }
 0x578   :  { %v895_v60 = vrot.slane %v893_v8, 1  ;;  %v2052_v36 = vpop.xlane.xlu0 %971  ;;  %v898_v0 = vadd.f32 %v893_v8, %v869_v52  ;;  %v1181_v8 = vsel %vm137_vm0, %v2033_v30, 0.0 }
 0x57a   :  { %v899_v53 = vadd.f32 %v895_v60, %v878_v54  ;;  %v908_v12 = vrot.slane %v898_v0, %v1588_v40  ;;  %v1249_v54 = vsel %vm137_vm0, %v1219_v34, 0.0  ;;  %v1288_v60 = vsel %vm252_vm1, %v2037_v61, 0.0 }
 0x57c   :  { %v915_v29 = vrot.slane %v899_v53, %v1588_v40  ;;  %v2055_v1 = vpop.xlane.xlu0 %974 }
 0x57e   :  { %v918_v56 = vrot.slane %v915_v29, 7 }
 0x580   :  { %v919_v31 = vsel %vm299_vm3, %v918_v56, %v908_v12  ;;  %v2059_v5 = vpop.xlane.xlu0 %977  ;;  %v935_v12 = vld [vmem:[#allocation10 + $0x80] sm:$0xff] }
 0x581   :  { %v920_v28 = vsel %vm301_vm4, %v918_v56, %v919_v31 }
 0x582   :  { %v921_v43 = vsel %vm303_vm5, %v918_v56, %v920_v28  ;;  %v937_v28 = vld [vmem:[#allocation10 + $0x90] sm:$0xff] }
 0x583   :  { %v922_v39 = vsel %vm305_vm6, %v918_v56, %v921_v43  ;;  %v936_v56 = vld [vmem:[#allocation10 + $0x88] sm:$0xff] }
 0x584   :  { %v2064_v9 = vpop.xlane.xlu0 %980  ;;  %924 = vst [vmem:[#allocation11 + $0x6] sm:$0x3] %v922_v39 }
 0x588   :  { %v2066_v57 = vpop.xlane.xlu0 %986 }
 0x58c   :  { %v2068_v14 = vpop.xlane.xlu0 %989 }
 0x590   :  { %v2070_v48 = vpop.xlane.xlu0 %992 }
 0x594   :  { %v1003_v33 = vpop.permute.xlu0 %1002 }
 0x595   :  { %v1026_v50 = vsel %vm137_vm0, %v1003_v33, 0.0  ;;  %v938_v33 = vld [vmem:[#allocation10 + $0x98] sm:$0xff] }
 0x596   :  { %1027 = vadd.xlane.f32.xlu1 %v1026_v50 }
 0x598   :  { %v1007_v44 = vpop.permute.xlu0 %1006 }
 0x599   :  { %v1032_v62 = vsel %vm137_vm0, %v1007_v44, 0.0 }
 0x59a   :  { %1033 = vadd.xlane.f32.xlu0 %v1032_v62 }
 0x59c   :  { %v1009_v21 = vpop.permute.xlu0 %1008 }
 0x59d   :  { %v1035_v37 = vsel %vm137_vm0, %v1009_v21, 0.0 }
 0x59e   :  { %1036 = vadd.xlane.f32.xlu0 %v1035_v37 }
 0x5a0   :  { %v1011_v2 = vpop.permute.xlu0 %1010 }
 0x5a1   :  { %v1038_v13 = vsel %vm137_vm0, %v1011_v2, 0.0  ;;  %v940_v2 = vld [vmem:[#allocation10 + $0x148] sm:$0xff] }
 0x5a2   :  { %1039 = vadd.xlane.f32.xlu1 %v1038_v13 }
 0x5a4   :  { %v1013_v63 = vpop.permute.xlu0 %1012 }
 0x5a5   :  { %v1041_v26 = vsel %vm137_vm0, %v1013_v63, 0.0  ;;  %v941_v63 = vld [vmem:[#allocation10 + $0x150] sm:$0xff] }
 0x5a6   :  { %1045 = vadd.xlane.f32.xlu1 %v1044_v42  ;;  %1042 = vadd.xlane.f32.xlu0 %v1041_v26 }
 0x5a8   :  { %v1213_v20 = vpop.permute.xlu0 %1212 }
 0x5a9   :  { %v1240_v16 = vsel %vm137_vm0, %v1213_v20, 0.0 }
 0x5aa   :  { %1085 = vadd.xlane.f32.xlu1 %v1084_v55  ;;  %1048 = vadd.xlane.f32.xlu0 %v1047_v18 }
 0x5ac   :  { %v1205_v27 = vpop.permute.xlu0 %1204 }
 0x5ad   :  { %v1228_v51 = vsel %vm137_vm0, %v1205_v27, 0.0 }
 0x5ae   :  { %1173 = vadd.xlane.f32.xlu1 %v1172_v35  ;;  %1099 = vadd.xlane.f32.xlu0 %v1098_v10 }
 0x5b0   :  { %v1217_v3 = vpop.permute.xlu0 %1216 }
 0x5b1   :  { %v1246_v46 = vsel %vm137_vm0, %v1217_v3, 0.0 }
 0x5b2   :  { %1185 = vadd.xlane.f32.xlu1 %v1184_v17  ;;  %1176 = vadd.xlane.f32.xlu0 %v1175_v22 }
 0x5b4   :  { %v1209_v23 = vpop.permute.xlu0 %1208 }
 0x5b5   :  { %v1234_v25 = vsel %vm137_vm0, %v1209_v23, 0.0 }
 0x5b6   :  { %1188 = vadd.xlane.f32.xlu0 %v1187_v38  ;;  %1241 = vadd.xlane.f32.xlu1 %v1240_v16 }
 0x5b8   :  { %v1211_v52 = vpop.permute.xlu0 %1210 }
 0x5b9   :  { %v1237_v47 = vsel %vm137_vm0, %v1211_v52, 0.0 }
 0x5ba   :  { %1244 = vadd.xlane.f32.xlu0 %v1243_v24  ;;  %1191 = vadd.xlane.f32.xlu1 %v1190_v59 }
 0x5bc   :  { %v1292_v0 = vpop.permute.xlu0 %1291 }
 0x5bd   :  { %v1294_v15 = vsel %vm252_vm1, %v1292_v0, 0.0 }
 0x5be   :  { %1232 = vadd.xlane.f32.xlu1 %v1231_v58  ;;  %1229 = vadd.xlane.f32.xlu0 %v1228_v51 }
 0x5c2   :  { %1179 = vadd.xlane.f32.xlu1 %v1178_v45  ;;  %1247 = vadd.xlane.f32.xlu0 %v1246_v46  ;;  %v88_v46 = vld [vmem:[#allocation7 + $0x8] sm:$0xf] }
 0x5c6   :  { %1194 = vadd.xlane.f32.xlu0 %v1193_v41  ;;  %1235 = vadd.xlane.f32.xlu1 %v1234_v25 }
 0x5ca   :  { %1250 = vadd.xlane.f32.xlu0 %v1249_v54  ;;  %1182 = vadd.xlane.f32.xlu1 %v1181_v8 }
 0x5ce   :  { %1238 = vadd.xlane.f32.xlu0 %v1237_v47  ;;  %1289 = vadd.xlane.f32.xlu1 %v1288_v60 }
 0x5d2   :  { %1295 = vadd.xlane.f32.xlu0 %v1294_v15 }
 0x5ed   :  { %v1031_v53 = vpop.xlane.xlu0 %1030 }
 0x5ee   :  { %v1051_v31 = vsel %vm93_vm2, %v2055_v1, %v1031_v53 }
 0x5ef   :  { %v1059_v11 = vmul.f32 %v1051_v31, %v936_v56 }
 0x61f   :  { %v1028_v29 = vpop.xlane.xlu1 %1027 }
 0x620   :  { %v1050_v30 = vsel %vm93_vm2, %v2052_v36, %v1028_v29 }
 0x621   :  { %v1058_v61 = vmul.f32 %v1050_v30, %v935_v12 }
 0x623   :  { %v1034_v43 = vpop.xlane.xlu0 %1033  ;;  %v1066_v50 = vadd.f32 %v1059_v11, %v1058_v61 }
 0x624   :  { %v1052_v39 = vsel %vm93_vm2, %v2059_v5, %v1034_v43 }
 0x625   :  { %v1060_v6 = vmul.f32 %v1052_v39, %v937_v28 }
 0x627   :  { %v1037_v19 = vpop.xlane.xlu0 %1036  ;;  %v1067_v44 = vadd.f32 %v1066_v50, %v1060_v6 }
 0x628   :  { %v1053_v36 = vsel %vm93_vm2, %v2064_v9, %v1037_v19 }
 0x629   :  { %v1061_v62 = vmul.f32 %v1053_v36, %v938_v33  ;;  %v1149_v33 = vld [vmem:[#allocation10 + $0x168] sm:$0xff]  ;;  %v1148_v36 = vld [vmem:[#allocation10 + $0x160] sm:$0xff] }
 0x62b   :  { %v1068_v21 = vadd.f32 %v1067_v44, %v1061_v62  ;;  %v1040_v1 = vpop.xlane.xlu1 %1039  ;;  %v1150_v62 = vld [vmem:[#allocation10 + $0x170] sm:$0xff] }
 0x62c   :  { %v1054_v37 = vsel %vm93_vm2, %v2043_v7, %v1040_v1 }
 0x62d   :  { %v1069_v5 = vrot.slane %v1068_v21, 4  ;;  %v1062_v42 = vmul.f32 %v1054_v37, %v939_v4 }
 0x62f   :  { %v1046_v13 = vpop.xlane.xlu1 %1045  ;;  %v1043_v34 = vpop.xlane.xlu0 %1042  ;;  %v1070_v18 = vadd.f32 %v1069_v5, %v1068_v21  ;;  %v1145_v5 = vld [vmem:[#allocation10 + $0xa8] sm:$0xff] }
 0x630   :  { %v1056_v26 = vsel %vm93_vm2, %v2068_v14, %v1046_v13  ;;  %v1055_v9 = vsel %vm93_vm2, %v2066_v57, %v1043_v34  ;;  %v1144_v34 = vld [vmem:[#allocation10 + $0xa0] sm:$0xff] }
 0x631   :  { %v1063_v55 = vmul.f32 %v1055_v9, %v940_v2  ;;  %v1064_v10 = vmul.f32 %v1056_v26, %v941_v63  ;;  %v1071_v38 = vrot.slane %v1070_v18, 2 }
 0x633   :  { %v1075_v35 = vadd.f32 %v1063_v55, %v1062_v42  ;;  %v1086_v7 = vpop.xlane.xlu1 %1085  ;;  %v1049_v17 = vpop.xlane.xlu0 %1048  ;;  %v1072_v3 = vadd.f32 %v1071_v38, %v1070_v18  ;;  %v1146_v42 = vld [vmem:[#allocation10 + $0xb0] sm:$0xff] }
 0x634   :  { %v1057_v22 = vsel %vm93_vm2, %v2070_v48, %v1049_v17 }
 0x635   :  { %v1076_v20 = vadd.f32 %v1075_v35, %v1064_v10  ;;  %v1065_v16 = vmul.f32 %v1057_v22, %v942_v32  ;;  %v1073_v41 = vrot.slane %v1072_v3, 1  ;;  %v1151_v32 = vld [vmem:[#allocation10 + $0x178] sm:$0xff]  ;;  %v1305_v22 = vrot.slane %v88_v46, %v1588_v40 }
 0x637   :  { %v1077_v14 = vadd.f32 %v1076_v20, %v1065_v16  ;;  %v1174_v27 = vpop.xlane.xlu1 %1173  ;;  %v1100_v59 = vpop.xlane.xlu0 %1099  ;;  %v1074_v47 = vadd.f32 %v1073_v41, %v1072_v3 }
 0x638   :  { %v1101_v45 = vsel %vm93_vm2, %v1086_v7, %v1100_v59 }
 0x639   :  { %v1078_v24 = vrot.slane %v1077_v14, 4  ;;  %v1102_v8 = vmul.f32 %v1101_v45, %v88_v46 }
 0x63b   :  { %v1079_v57 = vadd.f32 %v1078_v24, %v1077_v14  ;;  %v1186_v51 = vpop.xlane.xlu1 %1185  ;;  %v1177_v58 = vpop.xlane.xlu0 %1176  ;;  %v1104_v0 = vrot.slane %v1102_v8, 1  ;;  %v1107_v29 = vadd.f32 %v1102_v8, %v1074_v47 }
 0x63d   :  { %v1080_v23 = vrot.slane %v1079_v57, 2  ;;  %v1117_v28 = vrot.slane %v1107_v29, %v1588_v40 }
 0x63f   :  { %v1081_v25 = vadd.f32 %v1080_v23, %v1079_v57  ;;  %v1242_v48 = vpop.xlane.xlu1 %1241  ;;  %v1189_v52 = vpop.xlane.xlu0 %1188 }
 0x640   :  { %v1256_v44 = vsel %vm93_vm2, %v1186_v51, %v1242_v48 }
 0x641   :  { %v1082_v54 = vrot.slane %v1081_v25, 1  ;;  %v1264_v26 = vmul.f32 %v1256_v44, %v1148_v36 }
 0x643   :  { %v1083_v60 = vadd.f32 %v1082_v54, %v1081_v25  ;;  %v1192_v15 = vpop.xlane.xlu1 %1191  ;;  %v1245_v53 = vpop.xlane.xlu0 %1244  ;;  %v1306_v25 = vcombine.high %v1305_v22, %v1305_v22 }
 0x644   :  { %v1257_v50 = vsel %vm93_vm2, %v1189_v52, %v1245_v53 }
 0x645   :  { %v1108_v12 = vadd.f32 %v1104_v0, %v1083_v60  ;;  %v1265_v4 = vmul.f32 %v1257_v50, %v1149_v33 }
 0x647   :  { %v1124_v30 = vrot.slane %v1108_v12, %v1588_v40  ;;  %v1233_v56 = vpop.xlane.xlu1 %1232  ;;  %v1230_v31 = vpop.xlane.xlu0 %1229  ;;  %v1277_v18 = vadd.f32 %v1265_v4, %v1264_v26 }
 0x648   :  { %v1253_v13 = vsel %vm93_vm2, %v1177_v58, %v1233_v56  ;;  %v1252_v63 = vsel %vm93_vm2, %v1174_v27, %v1230_v31  ;;  %v1147_v27 = vld [vmem:[#allocation10 + $0xb8] sm:$0xff] }
 0x649   :  { %v1127_v61 = vrot.slane %v1124_v30, 7  ;;  %v1261_v10 = vmul.f32 %v1253_v13, %v1145_v5  ;;  %v1260_v35 = vmul.f32 %v1252_v63, %v1144_v34 }
 0x64b   :  { %v1128_v43 = vsel %vm299_vm3, %v1127_v61, %v1117_v28  ;;  %v1180_v39 = vpop.xlane.xlu1 %1179  ;;  %v1248_v11 = vpop.xlane.xlu0 %1247  ;;  %v1268_v59 = vadd.f32 %v1261_v10, %v1260_v35 }
 0x64c   :  { %v1129_v6 = vsel %vm301_vm4, %v1127_v61, %v1128_v43  ;;  %v1258_v21 = vsel %vm93_vm2, %v1192_v15, %v1248_v11 }
 0x64d   :  { %v1130_v19 = vsel %vm303_vm5, %v1127_v61, %v1129_v6  ;;  %v1266_v9 = vmul.f32 %v1258_v21, %v1150_v62 }
 0x64e   :  { %v1131_v1 = vsel %vm305_vm6, %v1127_v61, %v1130_v19 }
 0x64f   :  { %v1236_v37 = vpop.xlane.xlu1 %1235  ;;  %v1195_v2 = vpop.xlane.xlu0 %1194  ;;  %1133 = vst [vmem:[#allocation11 + $0x8] sm:$0x3] %v1131_v1  ;;  %v1278_v20 = vadd.f32 %v1277_v18, %v1266_v9 }
 0x650   :  { %v1254_v55 = vsel %vm93_vm2, %v1180_v39, %v1236_v37 }
 0x651   :  { %v1262_v16 = vmul.f32 %v1254_v55, %v1146_v42 }
 0x653   :  { %v1251_v7 = vpop.xlane.xlu0 %1250  ;;  %v1183_v14 = vpop.xlane.xlu1 %1182  ;;  %v1269_v51 = vadd.f32 %v1268_v59, %v1262_v16 }
 0x654   :  { %v1259_v17 = vsel %vm93_vm2, %v1195_v2, %v1251_v7 }
 0x655   :  { %v1267_v38 = vmul.f32 %v1259_v17, %v1151_v32 }
 0x657   :  { %v1279_v24 = vadd.f32 %v1278_v20, %v1267_v38  ;;  %v1239_v57 = vpop.xlane.xlu0 %1238  ;;  %v1290_v23 = vpop.xlane.xlu1 %1289 }
 0x658   :  { %v1255_v3 = vsel %vm93_vm2, %v1183_v14, %v1239_v57 }
 0x659   :  { %v1280_v58 = vrot.slane %v1279_v24, 4  ;;  %v1263_v45 = vmul.f32 %v1255_v3, %v1147_v27 }
 0x65b   :  { %v1281_v41 = vadd.f32 %v1280_v58, %v1279_v24  ;;  %v1270_v8 = vadd.f32 %v1269_v51, %v1263_v45  ;;  %v1296_v48 = vpop.xlane.xlu0 %1295 }
 0x65c   :  { %v1297_v46 = vsel %vm93_vm2, %v1290_v23, %v1296_v48 }
 0x65d   :  { %v1282_v52 = vrot.slane %v1281_v41, 2  ;;  %v1271_v54 = vrot.slane %v1270_v8, 4  ;;  %v1308_v47 = vmul.f32 %v1306_v25, %v1297_v46 }
 0x65f   :  { %v1283_v60 = vadd.f32 %v1282_v52, %v1281_v41  ;;  %v1272_v0 = vadd.f32 %v1271_v54, %v1270_v8  ;;  %v1310_v29 = vrot.slane %v1308_v47, 1 }
 0x661   :  { %v1273_v15 = vrot.slane %v1272_v0, 2  ;;  %v1284_v53 = vrot.slane %v1283_v60, 1 }
 0x663   :  { %v1274_v12 = vadd.f32 %v1273_v15, %v1272_v0  ;;  %v1285_v30 = vadd.f32 %v1284_v53, %v1283_v60 }
 0x665   :  { %v1275_v56 = vrot.slane %v1274_v12, 1  ;;  %v1314_v31 = vadd.f32 %v1310_v29, %v1285_v30 }
 0x667   :  { %v1276_v28 = vadd.f32 %v1275_v56, %v1274_v12  ;;  %v1330_v61 = vrot.slane %v1314_v31, %v1588_v40 }
 0x669   :  { %v1313_v43 = vadd.f32 %v1308_v47, %v1276_v28  ;;  %v1333_v49 = vrot.slane %v1330_v61, 7 }
 0x66b   :  { %v1323_v39 = vrot.slane %v1313_v43, %v1588_v40 }
 0x66d   :  { %v1334_v11 = vsel %vm299_vm3, %v1333_v49, %v1323_v39 }
 0x66e   :  { %v1335_v6 = vsel %vm301_vm4, %v1333_v49, %v1334_v11 }
 0x66f   :  { %v1336_v33 = vsel %vm303_vm5, %v1333_v49, %v1335_v6 }
 0x670   :  { %v1337_v50 = vsel %vm305_vm6, %v1333_v49, %v1336_v33 }
 0x671   :  { %1339 = vst [vmem:[#allocation11 + $0xa] sm:$0x3] %v1337_v50 }
 0x672   :  { %1480 = shalt.err (!%p1477_p1)
}
 0x673   :  { %1349 = dma.vmem_to_hbm [thread:$0]  %s1347_s17, 192, %s2174_s5, [#allocation4]  }
 0x674   :  { %1495 = dma.done.wait [#allocation4], 192  }
 0x675   :  { %1496 = vsyncadd [#allocation4], 4294967104 }
 0x676   :  { %1353 = vsyncpa [#allocation3], 1 }
 0x677   :  { %1354 = vsyncpa [#allocation6], 1 }
 0x678   :  { %1355 = vsyncpa [#allocation9], 1 }
 0x679   :  { %1356 = vsyncpa [#allocation4], 1 }

</bundles_post_ra>
